<compile_context>
chip_gen: v5e
topology: v5e:2x2
jax: 0.10.0
libtpu: 0.0.40
codegen_flags: <defaults>
</compile_context>

<pallas_src>
import jax
import jax.numpy as jnp
from jax.experimental import pallas as pl
from jax.experimental.pallas import tpu as pltpu

# ---- problem sizes (consistent with the module's constructor) ----
S = 8    # sequence_length
B = 4    # batch_size
H = 32   # hidden_size
D = 2    # hidden_layer_depth   (kernel below is specialized for D == 2)
L = 16   # latent_length
O = 1    # output_size

G = 4 * H   # gate width per cell


def decoder_kernel(latent_ref, wl2h_ref, bl2h_ref,
                   x0_ref, wtop_ref, whh1_ref, b1_ref,
                   wh2o_ref, bh2o_ref,
                   out_ref):
    f32 = jnp.float32

    # ---- latent_to_hidden : (B, H); h_0 = stack([h_state]*D), c_0 = zeros ----
    h_init = (jnp.dot(latent_ref[...], wl2h_ref[...],
                      preferred_element_type=f32)
              + bl2h_ref[...])
    h0, c0 = h_init, jnp.zeros((B, H), f32)
    h1, c1 = h_init, jnp.zeros((B, H), f32)

    # ---- hoist all loop-invariant reads / broadcasts ----
    wtop = wtop_ref[...]                                  # (H, 8H) = [W_hh0 | W_ih1] (cols pre-scaled)
    whh1 = whh1_ref[...]                                  # (H, 4H)
    b1 = jnp.broadcast_to(b1_ref[...], (B, G))            # (bih1 + bhh1), pre-scaled
    x0all = x0_ref[...]                                   # (S, B, 4H) precomputed layer-0 input term

    # Single-tanh gate activation:  sigmoid(z) = 0.5*tanh(z/2) + 0.5 for the
    # i/f/o lanes (whose pre-activations were halved via wrapper-side column
    # scaling), plain tanh for the g lanes.
    lane = jax.lax.broadcasted_iota(jnp.int32, (B, G), 1)
    g_mask = (lane >= 2 * H) & (lane < 3 * H)
    gsc = jnp.where(g_mask, 1.0, 0.5).astype(f32)
    gof = jnp.where(g_mask, 0.0, 0.5).astype(f32)

    def cell_update(pre, c_prev):
        a = jnp.tanh(pre) * gsc + gof                     # one EUP pass for all 4 gates
        i = a[:, 0 * H:1 * H]
        f = a[:, 1 * H:2 * H]
        g = a[:, 2 * H:3 * H]
        o = a[:, 3 * H:4 * H]
        c_new = f * c_prev + i * g
        h_new = o * jnp.tanh(c_new)
        return h_new, c_new

    # ---- wavefront over the two layers: S + D - 1 = 9 fully unrolled waves ----
    # wave w: layer 0 computes t = w (if w < S), layer 1 computes t = w - 1
    # (if w >= 1).  Both depend only on state from wave w - 1.
    h_tops = []
    for w in range(S + 1):
        l0 = w < S
        l1 = w >= 1

        if l0 and l1:
            gboth = jnp.dot(h0, wtop, preferred_element_type=f32)   # (B, 8H): both cells off one push
            g0 = gboth[:, :G]
            g1x = gboth[:, G:]
        elif l0:
            g0 = jnp.dot(h0, wtop[:, :G], preferred_element_type=f32)
        else:
            g1x = jnp.dot(h0, wtop[:, G:], preferred_element_type=f32)

        if l1:
            # independent second MXU push (pipelines behind the first)
            g1 = g1x + jnp.dot(h1, whh1, preferred_element_type=f32) + b1

        if l0:
            h0, c0 = cell_update(g0 + x0all[w], c0)
        if l1:
            h1, c1 = cell_update(g1, c1)
            h_tops.append(h1)                              # top-layer hidden at t = w - 1

    # ---- deferred hidden_to_output: one (S*B, H) @ (H, O) matmul + one store ----
    htop = jnp.concatenate(h_tops, axis=0)                 # (S*B, H)
    out = (jnp.dot(htop, wh2o_ref[...], preferred_element_type=f32)
           + bh2o_ref[...])
    out_ref[...] = out.astype(out_ref.dtype)


def decoder_forward(latent, dec_inputs, params):
    assert D == 2, "wavefront kernel is specialized for hidden_layer_depth == 2"

    # Wrapper-side weight packing (plain XLA, done once):
    #   * halve the i/f/o gate columns so the kernel can use the
    #     sigmoid(z) = 0.5*tanh(z/2) + 0.5 single-tanh trick,
    #   * pre-sum the biases,
    #   * pack [W_hh0 | W_ih1] for the fused wavefront matmul,
    #   * precompute the layer-0 input term for all S steps.
    col_scale = jnp.concatenate([
        jnp.full((2 * H,), 0.5, jnp.float32),   # i, f
        jnp.ones((H,), jnp.float32),            # g (stays tanh)
        jnp.full((H,), 0.5, jnp.float32),       # o
    ])

    wih0_s = params["wih0"] * col_scale                                   # (1, 4H)
    whh0_s = params["whh0"] * col_scale                                   # (H, 4H)
    b0_s = (params["bih0"] + params["bhh0"]) * col_scale                  # (1, 4H)
    wih1_s = params["wih_r"][0] * col_scale                               # (H, 4H)
    whh1_s = params["whh_r"][0] * col_scale                               # (H, 4H)
    b1_s = (params["bih_r"][0] + params["bhh_r"][0]) * col_scale          # (1, 4H)

    wtop = jnp.concatenate([whh0_s, wih1_s], axis=1)                      # (H, 8H)
    x0term = dec_inputs * wih0_s[None] + b0_s[None]                       # (S, B, 4H)

    args = (latent, params["wl2h"], params["bl2h"],
            x0term, wtop, whh1_s, b1_s,
            params["wh2o"], params["bh2o"])
    vmem = pl.BlockSpec(memory_space=pltpu.MemorySpace.VMEM)

    out_flat = pl.pallas_call(
        decoder_kernel,
        out_shape=jax.ShapeDtypeStruct((S * B, O), jnp.float32),
        in_specs=[vmem] * len(args),
        out_specs=vmem,
    )(*args)
    # metadata-only reshape back to the module's (S, B, O) output layout
    return out_flat.reshape(S, B, O)


# ---------------- pure-JAX reference (for a correctness check) ----------------
def decoder_ref(latent, dec_inputs, p):
    h_state = latent @ p["wl2h"] + p["bl2h"]
    hs = [h_state for _ in range(D)]
    cs = [jnp.zeros((B, H), jnp.float32) for _ in range(D)]
    outs = []

    def cell(x, h_prev, c_prev, wih, whh, bih, bhh):
        gates = x @ wih + h_prev @ whh + bih + bhh
        i = jax.nn.sigmoid(gates[:, 0 * H:1 * H])
        f = jax.nn.sigmoid(gates[:, 1 * H:2 * H])
        g = jnp.tanh(gates[:, 2 * H:3 * H])
        o = jax.nn.sigmoid(gates[:, 3 * H:4 * H])
        c = f * c_prev + i * g
        return o * jnp.tanh(c), c

    for t in range(S):
        x = dec_inputs[t]
        hs[0], cs[0] = cell(x, hs[0], cs[0],
                            p["wih0"], p["whh0"], p["bih0"], p["bhh0"])
        x = hs[0]
        for l in range(1, D):
            hs[l], cs[l] = cell(x, hs[l], cs[l],
                                p["wih_r"][l - 1], p["whh_r"][l - 1],
                                p["bih_r"][l - 1], p["bhh_r"][l - 1])
            x = hs[l]
        outs.append(x @ p["wh2o"] + p["bh2o"])
    return jnp.stack(outs)


def make_params(key):
    ks = jax.random.split(key, 12)

    def xavier(k, fan_in, fan_out, shape):
        lim = jnp.sqrt(6.0 / (fan_in + fan_out))
        return jax.random.uniform(k, shape, jnp.float32, -lim, lim)

    def lstm_u(k, shape):
        lim = 1.0 / jnp.sqrt(jnp.float32(H))
        return jax.random.uniform(k, shape, jnp.float32, -lim, lim)

    return {
        # latent_to_hidden: xavier_uniform weight
        "wl2h": xavier(ks[0], L, H, (L, H)),
        "bl2h": jax.random.uniform(ks[1], (1, H), jnp.float32,
                                   -1.0 / jnp.sqrt(L), 1.0 / jnp.sqrt(L)),
        # LSTM layer 0 (input size 1)
        "wih0": lstm_u(ks[2], (1, 4 * H)),
        "whh0": lstm_u(ks[3], (H, 4 * H)),
        "bih0": lstm_u(ks[4], (1, 4 * H)),
        "bhh0": lstm_u(ks[5], (1, 4 * H)),
        # LSTM layers 1..D-1 (input size H), stacked on leading axis
        "wih_r": lstm_u(ks[6], (D - 1, H, 4 * H)),
        "whh_r": lstm_u(ks[7], (D - 1, H, 4 * H)),
        "bih_r": lstm_u(ks[8], (D - 1, 1, 4 * H)),
        "bhh_r": lstm_u(ks[9], (D - 1, 1, 4 * H)),
        # hidden_to_output: xavier_uniform weight
        "wh2o": xavier(ks[10], H, O, (H, O)),
        "bh2o": jax.random.uniform(ks[11], (1, O), jnp.float32,
                                   -1.0 / jnp.sqrt(H), 1.0 / jnp.sqrt(H)),
    }


if __name__ == "__main__":
    key = jax.random.PRNGKey(0)
    k_lat, k_par = jax.random.split(key)
    params = make_params(k_par)

    latent = jax.random.normal(k_lat, (B, L), jnp.float32)
    dec_inputs = jnp.zeros((S, B, 1), jnp.float32)   # self.decoder_inputs (zeros)

    out = decoder_forward(latent, dec_inputs, params)
    out = jax.block_until_ready(out)

    ref = decoder_ref(latent, dec_inputs, params)
    assert out.shape == (S, B, O)
    # tolerance slightly loosened: the single-tanh sigmoid identity is exact in
    # real arithmetic but rounds differently from the reference sigmoid path.
    assert jnp.allclose(out, ref, rtol=1e-4, atol=1e-4), "mismatch vs reference"

    print("KERNEL_OK")
</pallas_src>

<mosaic_0001>
module attributes {stable_mosaic.version = 11 : i64} {
  func.func @decoder_kernel(%arg0: memref<4x16xf32, #tpu.memory_space<vmem>>, %arg1: memref<16x32xf32, #tpu.memory_space<vmem>>, %arg2: memref<1x32xf32, #tpu.memory_space<vmem>>, %arg3: memref<8x4x128xf32, #tpu.memory_space<vmem>>, %arg4: memref<32x256xf32, #tpu.memory_space<vmem>>, %arg5: memref<32x128xf32, #tpu.memory_space<vmem>>, %arg6: memref<1x128xf32, #tpu.memory_space<vmem>>, %arg7: memref<32x1xf32, #tpu.memory_space<vmem>>, %arg8: memref<1x1xf32, #tpu.memory_space<vmem>>, %arg9: memref<32x1xf32, #tpu.memory_space<vmem>>) attributes {dimension_semantics = [], scalar_prefetch = 0 : i64, scratch_operands = 0 : i64, tpu.core_type = #tpu.core_type<tc>} {
    %c0 = arith.constant 0 : index
    %c0_0 = arith.constant 0 : index
    %0 = vector.load %arg0[%c0, %c0_0] : memref<4x16xf32, #tpu.memory_space<vmem>>, vector<4x16xf32>
    %c0_1 = arith.constant 0 : index
    %c0_2 = arith.constant 0 : index
    %1 = vector.load %arg1[%c0_1, %c0_2] : memref<16x32xf32, #tpu.memory_space<vmem>>, vector<16x32xf32>
    %cst = arith.constant dense<0.000000e+00> : vector<4x32xf32>
    %2 = tpu.matmul %0, %1, %cst {dimension_numbers = #tpu.dot_dimension_numbers<[1], [0], [0], [1], [0, 0, 1, 1], [], []>} : vector<4x16xf32>, vector<16x32xf32>, vector<4x32xf32> -> vector<4x32xf32>
    %c0_3 = arith.constant 0 : index
    %c0_4 = arith.constant 0 : index
    %3 = vector.load %arg2[%c0_3, %c0_4] : memref<1x32xf32, #tpu.memory_space<vmem>>, vector<1x32xf32>
    %4 = vector.broadcast %3 : vector<1x32xf32> to vector<4x32xf32>
    %5 = arith.addf %2, %4 : vector<4x32xf32>
    %cst_5 = arith.constant 0.000000e+00 : f32
    %6 = vector.broadcast %cst_5 : f32 to vector<4x32xf32>
    %cst_6 = arith.constant 0.000000e+00 : f32
    %7 = vector.broadcast %cst_6 : f32 to vector<4x32xf32>
    %c0_7 = arith.constant 0 : index
    %c0_8 = arith.constant 0 : index
    %8 = vector.load %arg4[%c0_7, %c0_8] : memref<32x256xf32, #tpu.memory_space<vmem>>, vector<32x256xf32>
    %c0_9 = arith.constant 0 : index
    %c0_10 = arith.constant 0 : index
    %9 = vector.load %arg5[%c0_9, %c0_10] : memref<32x128xf32, #tpu.memory_space<vmem>>, vector<32x128xf32>
    %c0_11 = arith.constant 0 : index
    %c0_12 = arith.constant 0 : index
    %10 = vector.load %arg6[%c0_11, %c0_12] : memref<1x128xf32, #tpu.memory_space<vmem>>, vector<1x128xf32>
    %11 = vector.shape_cast %10 : vector<1x128xf32> to vector<1x128xf32>
    %12 = vector.broadcast %11 : vector<1x128xf32> to vector<4x128xf32>
    %c0_13 = arith.constant 0 : index
    %c0_14 = arith.constant 0 : index
    %c0_15 = arith.constant 0 : index
    %13 = vector.load %arg3[%c0_13, %c0_14, %c0_15] : memref<8x4x128xf32, #tpu.memory_space<vmem>>, vector<8x4x128xf32>
    %14 = tpu.iota {dimensions = array<i32: 1>} : vector<4x128xi32>
    %c64_i32 = arith.constant 64 : i32
    %15 = vector.broadcast %c64_i32 : i32 to vector<4x128xi32>
    %16 = arith.cmpi sge, %14, %15 : vector<4x128xi32>
    %c96_i32 = arith.constant 96 : i32
    %17 = vector.broadcast %c96_i32 : i32 to vector<4x128xi32>
    %18 = arith.cmpi slt, %14, %17 : vector<4x128xi32>
    %19 = arith.andi %16, %18 : vector<4x128xi1>
    %cst_16 = arith.constant 1.000000e+00 : f32
    %cst_17 = arith.constant 5.000000e-01 : f32
    %20 = vector.broadcast %cst_16 : f32 to vector<4x128xf32>
    %21 = vector.broadcast %cst_17 : f32 to vector<4x128xf32>
    %22 = arith.select %19, %20, %21 : vector<4x128xi1>, vector<4x128xf32>
    %cst_18 = arith.constant 0.000000e+00 : f32
    %cst_19 = arith.constant 5.000000e-01 : f32
    %23 = vector.broadcast %cst_18 : f32 to vector<4x128xf32>
    %24 = vector.broadcast %cst_19 : f32 to vector<4x128xf32>
    %25 = arith.select %19, %23, %24 : vector<4x128xi1>, vector<4x128xf32>
    %26 = vector.extract_strided_slice %8 {offsets = [0, 0], sizes = [32, 128], strides = [1, 1]} : vector<32x256xf32> to vector<32x128xf32>
    %cst_20 = arith.constant dense<0.000000e+00> : vector<4x128xf32>
    %27 = tpu.matmul %5, %26, %cst_20 {dimension_numbers = #tpu.dot_dimension_numbers<[1], [0], [0], [1], [0, 0, 1, 1], [], []>} : vector<4x32xf32>, vector<32x128xf32>, vector<4x128xf32> -> vector<4x128xf32>
    %28 = vector.extract_strided_slice %13 {offsets = [0, 0, 0], sizes = [1, 4, 128], strides = [1, 1, 1]} : vector<8x4x128xf32> to vector<1x4x128xf32>
    %29 = vector.shape_cast %28 : vector<1x4x128xf32> to vector<4x128xf32>
    %30 = arith.addf %27, %29 : vector<4x128xf32>
    %31 = math.tanh %30 : vector<4x128xf32>
    %32 = arith.mulf %31, %22 : vector<4x128xf32>
    %33 = arith.addf %32, %25 : vector<4x128xf32>
    %34 = vector.extract_strided_slice %33 {offsets = [0, 0], sizes = [4, 32], strides = [1, 1]} : vector<4x128xf32> to vector<4x32xf32>
    %35 = vector.extract_strided_slice %33 {offsets = [0, 32], sizes = [4, 32], strides = [1, 1]} : vector<4x128xf32> to vector<4x32xf32>
    %36 = vector.extract_strided_slice %33 {offsets = [0, 64], sizes = [4, 32], strides = [1, 1]} : vector<4x128xf32> to vector<4x32xf32>
    %37 = vector.extract_strided_slice %33 {offsets = [0, 96], sizes = [4, 32], strides = [1, 1]} : vector<4x128xf32> to vector<4x32xf32>
    %38 = arith.mulf %35, %6 : vector<4x32xf32>
    %39 = arith.mulf %34, %36 : vector<4x32xf32>
    %40 = arith.addf %38, %39 : vector<4x32xf32>
    %41 = math.tanh %40 : vector<4x32xf32>
    %42 = arith.mulf %37, %41 : vector<4x32xf32>
    %cst_21 = arith.constant dense<0.000000e+00> : vector<4x256xf32>
    %43 = tpu.matmul %42, %8, %cst_21 {dimension_numbers = #tpu.dot_dimension_numbers<[1], [0], [0], [1], [0, 0, 1, 1], [], []>} : vector<4x32xf32>, vector<32x256xf32>, vector<4x256xf32> -> vector<4x256xf32>
    %44 = vector.extract_strided_slice %43 {offsets = [0, 0], sizes = [4, 128], strides = [1, 1]} : vector<4x256xf32> to vector<4x128xf32>
    %45 = vector.extract_strided_slice %43 {offsets = [0, 128], sizes = [4, 128], strides = [1, 1]} : vector<4x256xf32> to vector<4x128xf32>
    %cst_22 = arith.constant dense<0.000000e+00> : vector<4x128xf32>
    %46 = tpu.matmul %5, %9, %cst_22 {dimension_numbers = #tpu.dot_dimension_numbers<[1], [0], [0], [1], [0, 0, 1, 1], [], []>} : vector<4x32xf32>, vector<32x128xf32>, vector<4x128xf32> -> vector<4x128xf32>
    %47 = arith.addf %45, %46 : vector<4x128xf32>
    %48 = arith.addf %47, %12 : vector<4x128xf32>
    %49 = vector.extract_strided_slice %13 {offsets = [1, 0, 0], sizes = [1, 4, 128], strides = [1, 1, 1]} : vector<8x4x128xf32> to vector<1x4x128xf32>
    %50 = vector.shape_cast %49 : vector<1x4x128xf32> to vector<4x128xf32>
    %51 = arith.addf %44, %50 : vector<4x128xf32>
    %52 = math.tanh %51 : vector<4x128xf32>
    %53 = arith.mulf %52, %22 : vector<4x128xf32>
    %54 = arith.addf %53, %25 : vector<4x128xf32>
    %55 = vector.extract_strided_slice %54 {offsets = [0, 0], sizes = [4, 32], strides = [1, 1]} : vector<4x128xf32> to vector<4x32xf32>
    %56 = vector.extract_strided_slice %54 {offsets = [0, 32], sizes = [4, 32], strides = [1, 1]} : vector<4x128xf32> to vector<4x32xf32>
    %57 = vector.extract_strided_slice %54 {offsets = [0, 64], sizes = [4, 32], strides = [1, 1]} : vector<4x128xf32> to vector<4x32xf32>
    %58 = vector.extract_strided_slice %54 {offsets = [0, 96], sizes = [4, 32], strides = [1, 1]} : vector<4x128xf32> to vector<4x32xf32>
    %59 = arith.mulf %56, %40 : vector<4x32xf32>
    %60 = arith.mulf %55, %57 : vector<4x32xf32>
    %61 = arith.addf %59, %60 : vector<4x32xf32>
    %62 = math.tanh %61 : vector<4x32xf32>
    %63 = arith.mulf %58, %62 : vector<4x32xf32>
    %64 = math.tanh %48 : vector<4x128xf32>
    %65 = arith.mulf %64, %22 : vector<4x128xf32>
    %66 = arith.addf %65, %25 : vector<4x128xf32>
    %67 = vector.extract_strided_slice %66 {offsets = [0, 0], sizes = [4, 32], strides = [1, 1]} : vector<4x128xf32> to vector<4x32xf32>
    %68 = vector.extract_strided_slice %66 {offsets = [0, 32], sizes = [4, 32], strides = [1, 1]} : vector<4x128xf32> to vector<4x32xf32>
    %69 = vector.extract_strided_slice %66 {offsets = [0, 64], sizes = [4, 32], strides = [1, 1]} : vector<4x128xf32> to vector<4x32xf32>
    %70 = vector.extract_strided_slice %66 {offsets = [0, 96], sizes = [4, 32], strides = [1, 1]} : vector<4x128xf32> to vector<4x32xf32>
    %71 = arith.mulf %68, %7 : vector<4x32xf32>
    %72 = arith.mulf %67, %69 : vector<4x32xf32>
    %73 = arith.addf %71, %72 : vector<4x32xf32>
    %74 = math.tanh %73 : vector<4x32xf32>
    %75 = arith.mulf %70, %74 : vector<4x32xf32>
    %cst_23 = arith.constant dense<0.000000e+00> : vector<4x256xf32>
    %76 = tpu.matmul %63, %8, %cst_23 {dimension_numbers = #tpu.dot_dimension_numbers<[1], [0], [0], [1], [0, 0, 1, 1], [], []>} : vector<4x32xf32>, vector<32x256xf32>, vector<4x256xf32> -> vector<4x256xf32>
    %77 = vector.extract_strided_slice %76 {offsets = [0, 0], sizes = [4, 128], strides = [1, 1]} : vector<4x256xf32> to vector<4x128xf32>
    %78 = vector.extract_strided_slice %76 {offsets = [0, 128], sizes = [4, 128], strides = [1, 1]} : vector<4x256xf32> to vector<4x128xf32>
    %cst_24 = arith.constant dense<0.000000e+00> : vector<4x128xf32>
    %79 = tpu.matmul %75, %9, %cst_24 {dimension_numbers = #tpu.dot_dimension_numbers<[1], [0], [0], [1], [0, 0, 1, 1], [], []>} : vector<4x32xf32>, vector<32x128xf32>, vector<4x128xf32> -> vector<4x128xf32>
    %80 = arith.addf %78, %79 : vector<4x128xf32>
    %81 = arith.addf %80, %12 : vector<4x128xf32>
    %82 = vector.extract_strided_slice %13 {offsets = [2, 0, 0], sizes = [1, 4, 128], strides = [1, 1, 1]} : vector<8x4x128xf32> to vector<1x4x128xf32>
    %83 = vector.shape_cast %82 : vector<1x4x128xf32> to vector<4x128xf32>
    %84 = arith.addf %77, %83 : vector<4x128xf32>
    %85 = math.tanh %84 : vector<4x128xf32>
    %86 = arith.mulf %85, %22 : vector<4x128xf32>
    %87 = arith.addf %86, %25 : vector<4x128xf32>
    %88 = vector.extract_strided_slice %87 {offsets = [0, 0], sizes = [4, 32], strides = [1, 1]} : vector<4x128xf32> to vector<4x32xf32>
    %89 = vector.extract_strided_slice %87 {offsets = [0, 32], sizes = [4, 32], strides = [1, 1]} : vector<4x128xf32> to vector<4x32xf32>
    %90 = vector.extract_strided_slice %87 {offsets = [0, 64], sizes = [4, 32], strides = [1, 1]} : vector<4x128xf32> to vector<4x32xf32>
    %91 = vector.extract_strided_slice %87 {offsets = [0, 96], sizes = [4, 32], strides = [1, 1]} : vector<4x128xf32> to vector<4x32xf32>
    %92 = arith.mulf %89, %61 : vector<4x32xf32>
    %93 = arith.mulf %88, %90 : vector<4x32xf32>
    %94 = arith.addf %92, %93 : vector<4x32xf32>
    %95 = math.tanh %94 : vector<4x32xf32>
    %96 = arith.mulf %91, %95 : vector<4x32xf32>
    %97 = math.tanh %81 : vector<4x128xf32>
    %98 = arith.mulf %97, %22 : vector<4x128xf32>
    %99 = arith.addf %98, %25 : vector<4x128xf32>
    %100 = vector.extract_strided_slice %99 {offsets = [0, 0], sizes = [4, 32], strides = [1, 1]} : vector<4x128xf32> to vector<4x32xf32>
    %101 = vector.extract_strided_slice %99 {offsets = [0, 32], sizes = [4, 32], strides = [1, 1]} : vector<4x128xf32> to vector<4x32xf32>
    %102 = vector.extract_strided_slice %99 {offsets = [0, 64], sizes = [4, 32], strides = [1, 1]} : vector<4x128xf32> to vector<4x32xf32>
    %103 = vector.extract_strided_slice %99 {offsets = [0, 96], sizes = [4, 32], strides = [1, 1]} : vector<4x128xf32> to vector<4x32xf32>
    %104 = arith.mulf %101, %73 : vector<4x32xf32>
    %105 = arith.mulf %100, %102 : vector<4x32xf32>
    %106 = arith.addf %104, %105 : vector<4x32xf32>
    %107 = math.tanh %106 : vector<4x32xf32>
    %108 = arith.mulf %103, %107 : vector<4x32xf32>
    %cst_25 = arith.constant dense<0.000000e+00> : vector<4x256xf32>
    %109 = tpu.matmul %96, %8, %cst_25 {dimension_numbers = #tpu.dot_dimension_numbers<[1], [0], [0], [1], [0, 0, 1, 1], [], []>} : vector<4x32xf32>, vector<32x256xf32>, vector<4x256xf32> -> vector<4x256xf32>
    %110 = vector.extract_strided_slice %109 {offsets = [0, 0], sizes = [4, 128], strides = [1, 1]} : vector<4x256xf32> to vector<4x128xf32>
    %111 = vector.extract_strided_slice %109 {offsets = [0, 128], sizes = [4, 128], strides = [1, 1]} : vector<4x256xf32> to vector<4x128xf32>
    %cst_26 = arith.constant dense<0.000000e+00> : vector<4x128xf32>
    %112 = tpu.matmul %108, %9, %cst_26 {dimension_numbers = #tpu.dot_dimension_numbers<[1], [0], [0], [1], [0, 0, 1, 1], [], []>} : vector<4x32xf32>, vector<32x128xf32>, vector<4x128xf32> -> vector<4x128xf32>
    %113 = arith.addf %111, %112 : vector<4x128xf32>
    %114 = arith.addf %113, %12 : vector<4x128xf32>
    %115 = vector.extract_strided_slice %13 {offsets = [3, 0, 0], sizes = [1, 4, 128], strides = [1, 1, 1]} : vector<8x4x128xf32> to vector<1x4x128xf32>
    %116 = vector.shape_cast %115 : vector<1x4x128xf32> to vector<4x128xf32>
    %117 = arith.addf %110, %116 : vector<4x128xf32>
    %118 = math.tanh %117 : vector<4x128xf32>
    %119 = arith.mulf %118, %22 : vector<4x128xf32>
    %120 = arith.addf %119, %25 : vector<4x128xf32>
    %121 = vector.extract_strided_slice %120 {offsets = [0, 0], sizes = [4, 32], strides = [1, 1]} : vector<4x128xf32> to vector<4x32xf32>
    %122 = vector.extract_strided_slice %120 {offsets = [0, 32], sizes = [4, 32], strides = [1, 1]} : vector<4x128xf32> to vector<4x32xf32>
    %123 = vector.extract_strided_slice %120 {offsets = [0, 64], sizes = [4, 32], strides = [1, 1]} : vector<4x128xf32> to vector<4x32xf32>
    %124 = vector.extract_strided_slice %120 {offsets = [0, 96], sizes = [4, 32], strides = [1, 1]} : vector<4x128xf32> to vector<4x32xf32>
    %125 = arith.mulf %122, %94 : vector<4x32xf32>
    %126 = arith.mulf %121, %123 : vector<4x32xf32>
    %127 = arith.addf %125, %126 : vector<4x32xf32>
    %128 = math.tanh %127 : vector<4x32xf32>
    %129 = arith.mulf %124, %128 : vector<4x32xf32>
    %130 = math.tanh %114 : vector<4x128xf32>
    %131 = arith.mulf %130, %22 : vector<4x128xf32>
    %132 = arith.addf %131, %25 : vector<4x128xf32>
    %133 = vector.extract_strided_slice %132 {offsets = [0, 0], sizes = [4, 32], strides = [1, 1]} : vector<4x128xf32> to vector<4x32xf32>
    %134 = vector.extract_strided_slice %132 {offsets = [0, 32], sizes = [4, 32], strides = [1, 1]} : vector<4x128xf32> to vector<4x32xf32>
    %135 = vector.extract_strided_slice %132 {offsets = [0, 64], sizes = [4, 32], strides = [1, 1]} : vector<4x128xf32> to vector<4x32xf32>
    %136 = vector.extract_strided_slice %132 {offsets = [0, 96], sizes = [4, 32], strides = [1, 1]} : vector<4x128xf32> to vector<4x32xf32>
    %137 = arith.mulf %134, %106 : vector<4x32xf32>
    %138 = arith.mulf %133, %135 : vector<4x32xf32>
    %139 = arith.addf %137, %138 : vector<4x32xf32>
    %140 = math.tanh %139 : vector<4x32xf32>
    %141 = arith.mulf %136, %140 : vector<4x32xf32>
    %cst_27 = arith.constant dense<0.000000e+00> : vector<4x256xf32>
    %142 = tpu.matmul %129, %8, %cst_27 {dimension_numbers = #tpu.dot_dimension_numbers<[1], [0], [0], [1], [0, 0, 1, 1], [], []>} : vector<4x32xf32>, vector<32x256xf32>, vector<4x256xf32> -> vector<4x256xf32>
    %143 = vector.extract_strided_slice %142 {offsets = [0, 0], sizes = [4, 128], strides = [1, 1]} : vector<4x256xf32> to vector<4x128xf32>
    %144 = vector.extract_strided_slice %142 {offsets = [0, 128], sizes = [4, 128], strides = [1, 1]} : vector<4x256xf32> to vector<4x128xf32>
    %cst_28 = arith.constant dense<0.000000e+00> : vector<4x128xf32>
    %145 = tpu.matmul %141, %9, %cst_28 {dimension_numbers = #tpu.dot_dimension_numbers<[1], [0], [0], [1], [0, 0, 1, 1], [], []>} : vector<4x32xf32>, vector<32x128xf32>, vector<4x128xf32> -> vector<4x128xf32>
    %146 = arith.addf %144, %145 : vector<4x128xf32>
    %147 = arith.addf %146, %12 : vector<4x128xf32>
    %148 = vector.extract_strided_slice %13 {offsets = [4, 0, 0], sizes = [1, 4, 128], strides = [1, 1, 1]} : vector<8x4x128xf32> to vector<1x4x128xf32>
    %149 = vector.shape_cast %148 : vector<1x4x128xf32> to vector<4x128xf32>
    %150 = arith.addf %143, %149 : vector<4x128xf32>
    %151 = math.tanh %150 : vector<4x128xf32>
    %152 = arith.mulf %151, %22 : vector<4x128xf32>
    %153 = arith.addf %152, %25 : vector<4x128xf32>
    %154 = vector.extract_strided_slice %153 {offsets = [0, 0], sizes = [4, 32], strides = [1, 1]} : vector<4x128xf32> to vector<4x32xf32>
    %155 = vector.extract_strided_slice %153 {offsets = [0, 32], sizes = [4, 32], strides = [1, 1]} : vector<4x128xf32> to vector<4x32xf32>
    %156 = vector.extract_strided_slice %153 {offsets = [0, 64], sizes = [4, 32], strides = [1, 1]} : vector<4x128xf32> to vector<4x32xf32>
    %157 = vector.extract_strided_slice %153 {offsets = [0, 96], sizes = [4, 32], strides = [1, 1]} : vector<4x128xf32> to vector<4x32xf32>
    %158 = arith.mulf %155, %127 : vector<4x32xf32>
    %159 = arith.mulf %154, %156 : vector<4x32xf32>
    %160 = arith.addf %158, %159 : vector<4x32xf32>
    %161 = math.tanh %160 : vector<4x32xf32>
    %162 = arith.mulf %157, %161 : vector<4x32xf32>
    %163 = math.tanh %147 : vector<4x128xf32>
    %164 = arith.mulf %163, %22 : vector<4x128xf32>
    %165 = arith.addf %164, %25 : vector<4x128xf32>
    %166 = vector.extract_strided_slice %165 {offsets = [0, 0], sizes = [4, 32], strides = [1, 1]} : vector<4x128xf32> to vector<4x32xf32>
    %167 = vector.extract_strided_slice %165 {offsets = [0, 32], sizes = [4, 32], strides = [1, 1]} : vector<4x128xf32> to vector<4x32xf32>
    %168 = vector.extract_strided_slice %165 {offsets = [0, 64], sizes = [4, 32], strides = [1, 1]} : vector<4x128xf32> to vector<4x32xf32>
    %169 = vector.extract_strided_slice %165 {offsets = [0, 96], sizes = [4, 32], strides = [1, 1]} : vector<4x128xf32> to vector<4x32xf32>
    %170 = arith.mulf %167, %139 : vector<4x32xf32>
    %171 = arith.mulf %166, %168 : vector<4x32xf32>
    %172 = arith.addf %170, %171 : vector<4x32xf32>
    %173 = math.tanh %172 : vector<4x32xf32>
    %174 = arith.mulf %169, %173 : vector<4x32xf32>
    %cst_29 = arith.constant dense<0.000000e+00> : vector<4x256xf32>
    %175 = tpu.matmul %162, %8, %cst_29 {dimension_numbers = #tpu.dot_dimension_numbers<[1], [0], [0], [1], [0, 0, 1, 1], [], []>} : vector<4x32xf32>, vector<32x256xf32>, vector<4x256xf32> -> vector<4x256xf32>
    %176 = vector.extract_strided_slice %175 {offsets = [0, 0], sizes = [4, 128], strides = [1, 1]} : vector<4x256xf32> to vector<4x128xf32>
    %177 = vector.extract_strided_slice %175 {offsets = [0, 128], sizes = [4, 128], strides = [1, 1]} : vector<4x256xf32> to vector<4x128xf32>
    %cst_30 = arith.constant dense<0.000000e+00> : vector<4x128xf32>
    %178 = tpu.matmul %174, %9, %cst_30 {dimension_numbers = #tpu.dot_dimension_numbers<[1], [0], [0], [1], [0, 0, 1, 1], [], []>} : vector<4x32xf32>, vector<32x128xf32>, vector<4x128xf32> -> vector<4x128xf32>
    %179 = arith.addf %177, %178 : vector<4x128xf32>
    %180 = arith.addf %179, %12 : vector<4x128xf32>
    %181 = vector.extract_strided_slice %13 {offsets = [5, 0, 0], sizes = [1, 4, 128], strides = [1, 1, 1]} : vector<8x4x128xf32> to vector<1x4x128xf32>
    %182 = vector.shape_cast %181 : vector<1x4x128xf32> to vector<4x128xf32>
    %183 = arith.addf %176, %182 : vector<4x128xf32>
    %184 = math.tanh %183 : vector<4x128xf32>
    %185 = arith.mulf %184, %22 : vector<4x128xf32>
    %186 = arith.addf %185, %25 : vector<4x128xf32>
    %187 = vector.extract_strided_slice %186 {offsets = [0, 0], sizes = [4, 32], strides = [1, 1]} : vector<4x128xf32> to vector<4x32xf32>
    %188 = vector.extract_strided_slice %186 {offsets = [0, 32], sizes = [4, 32], strides = [1, 1]} : vector<4x128xf32> to vector<4x32xf32>
    %189 = vector.extract_strided_slice %186 {offsets = [0, 64], sizes = [4, 32], strides = [1, 1]} : vector<4x128xf32> to vector<4x32xf32>
    %190 = vector.extract_strided_slice %186 {offsets = [0, 96], sizes = [4, 32], strides = [1, 1]} : vector<4x128xf32> to vector<4x32xf32>
    %191 = arith.mulf %188, %160 : vector<4x32xf32>
    %192 = arith.mulf %187, %189 : vector<4x32xf32>
    %193 = arith.addf %191, %192 : vector<4x32xf32>
    %194 = math.tanh %193 : vector<4x32xf32>
    %195 = arith.mulf %190, %194 : vector<4x32xf32>
    %196 = math.tanh %180 : vector<4x128xf32>
    %197 = arith.mulf %196, %22 : vector<4x128xf32>
    %198 = arith.addf %197, %25 : vector<4x128xf32>
    %199 = vector.extract_strided_slice %198 {offsets = [0, 0], sizes = [4, 32], strides = [1, 1]} : vector<4x128xf32> to vector<4x32xf32>
    %200 = vector.extract_strided_slice %198 {offsets = [0, 32], sizes = [4, 32], strides = [1, 1]} : vector<4x128xf32> to vector<4x32xf32>
    %201 = vector.extract_strided_slice %198 {offsets = [0, 64], sizes = [4, 32], strides = [1, 1]} : vector<4x128xf32> to vector<4x32xf32>
    %202 = vector.extract_strided_slice %198 {offsets = [0, 96], sizes = [4, 32], strides = [1, 1]} : vector<4x128xf32> to vector<4x32xf32>
    %203 = arith.mulf %200, %172 : vector<4x32xf32>
    %204 = arith.mulf %199, %201 : vector<4x32xf32>
    %205 = arith.addf %203, %204 : vector<4x32xf32>
    %206 = math.tanh %205 : vector<4x32xf32>
    %207 = arith.mulf %202, %206 : vector<4x32xf32>
    %cst_31 = arith.constant dense<0.000000e+00> : vector<4x256xf32>
    %208 = tpu.matmul %195, %8, %cst_31 {dimension_numbers = #tpu.dot_dimension_numbers<[1], [0], [0], [1], [0, 0, 1, 1], [], []>} : vector<4x32xf32>, vector<32x256xf32>, vector<4x256xf32> -> vector<4x256xf32>
    %209 = vector.extract_strided_slice %208 {offsets = [0, 0], sizes = [4, 128], strides = [1, 1]} : vector<4x256xf32> to vector<4x128xf32>
    %210 = vector.extract_strided_slice %208 {offsets = [0, 128], sizes = [4, 128], strides = [1, 1]} : vector<4x256xf32> to vector<4x128xf32>
    %cst_32 = arith.constant dense<0.000000e+00> : vector<4x128xf32>
    %211 = tpu.matmul %207, %9, %cst_32 {dimension_numbers = #tpu.dot_dimension_numbers<[1], [0], [0], [1], [0, 0, 1, 1], [], []>} : vector<4x32xf32>, vector<32x128xf32>, vector<4x128xf32> -> vector<4x128xf32>
    %212 = arith.addf %210, %211 : vector<4x128xf32>
    %213 = arith.addf %212, %12 : vector<4x128xf32>
    %214 = vector.extract_strided_slice %13 {offsets = [6, 0, 0], sizes = [1, 4, 128], strides = [1, 1, 1]} : vector<8x4x128xf32> to vector<1x4x128xf32>
    %215 = vector.shape_cast %214 : vector<1x4x128xf32> to vector<4x128xf32>
    %216 = arith.addf %209, %215 : vector<4x128xf32>
    %217 = math.tanh %216 : vector<4x128xf32>
    %218 = arith.mulf %217, %22 : vector<4x128xf32>
    %219 = arith.addf %218, %25 : vector<4x128xf32>
    %220 = vector.extract_strided_slice %219 {offsets = [0, 0], sizes = [4, 32], strides = [1, 1]} : vector<4x128xf32> to vector<4x32xf32>
    %221 = vector.extract_strided_slice %219 {offsets = [0, 32], sizes = [4, 32], strides = [1, 1]} : vector<4x128xf32> to vector<4x32xf32>
    %222 = vector.extract_strided_slice %219 {offsets = [0, 64], sizes = [4, 32], strides = [1, 1]} : vector<4x128xf32> to vector<4x32xf32>
    %223 = vector.extract_strided_slice %219 {offsets = [0, 96], sizes = [4, 32], strides = [1, 1]} : vector<4x128xf32> to vector<4x32xf32>
    %224 = arith.mulf %221, %193 : vector<4x32xf32>
    %225 = arith.mulf %220, %222 : vector<4x32xf32>
    %226 = arith.addf %224, %225 : vector<4x32xf32>
    %227 = math.tanh %226 : vector<4x32xf32>
    %228 = arith.mulf %223, %227 : vector<4x32xf32>
    %229 = math.tanh %213 : vector<4x128xf32>
    %230 = arith.mulf %229, %22 : vector<4x128xf32>
    %231 = arith.addf %230, %25 : vector<4x128xf32>
    %232 = vector.extract_strided_slice %231 {offsets = [0, 0], sizes = [4, 32], strides = [1, 1]} : vector<4x128xf32> to vector<4x32xf32>
    %233 = vector.extract_strided_slice %231 {offsets = [0, 32], sizes = [4, 32], strides = [1, 1]} : vector<4x128xf32> to vector<4x32xf32>
    %234 = vector.extract_strided_slice %231 {offsets = [0, 64], sizes = [4, 32], strides = [1, 1]} : vector<4x128xf32> to vector<4x32xf32>
    %235 = vector.extract_strided_slice %231 {offsets = [0, 96], sizes = [4, 32], strides = [1, 1]} : vector<4x128xf32> to vector<4x32xf32>
    %236 = arith.mulf %233, %205 : vector<4x32xf32>
    %237 = arith.mulf %232, %234 : vector<4x32xf32>
    %238 = arith.addf %236, %237 : vector<4x32xf32>
    %239 = math.tanh %238 : vector<4x32xf32>
    %240 = arith.mulf %235, %239 : vector<4x32xf32>
    %cst_33 = arith.constant dense<0.000000e+00> : vector<4x256xf32>
    %241 = tpu.matmul %228, %8, %cst_33 {dimension_numbers = #tpu.dot_dimension_numbers<[1], [0], [0], [1], [0, 0, 1, 1], [], []>} : vector<4x32xf32>, vector<32x256xf32>, vector<4x256xf32> -> vector<4x256xf32>
    %242 = vector.extract_strided_slice %241 {offsets = [0, 0], sizes = [4, 128], strides = [1, 1]} : vector<4x256xf32> to vector<4x128xf32>
    %243 = vector.extract_strided_slice %241 {offsets = [0, 128], sizes = [4, 128], strides = [1, 1]} : vector<4x256xf32> to vector<4x128xf32>
    %cst_34 = arith.constant dense<0.000000e+00> : vector<4x128xf32>
    %244 = tpu.matmul %240, %9, %cst_34 {dimension_numbers = #tpu.dot_dimension_numbers<[1], [0], [0], [1], [0, 0, 1, 1], [], []>} : vector<4x32xf32>, vector<32x128xf32>, vector<4x128xf32> -> vector<4x128xf32>
    %245 = arith.addf %243, %244 : vector<4x128xf32>
    %246 = arith.addf %245, %12 : vector<4x128xf32>
    %247 = vector.extract_strided_slice %13 {offsets = [7, 0, 0], sizes = [1, 4, 128], strides = [1, 1, 1]} : vector<8x4x128xf32> to vector<1x4x128xf32>
    %248 = vector.shape_cast %247 : vector<1x4x128xf32> to vector<4x128xf32>
    %249 = arith.addf %242, %248 : vector<4x128xf32>
    %250 = math.tanh %249 : vector<4x128xf32>
    %251 = arith.mulf %250, %22 : vector<4x128xf32>
    %252 = arith.addf %251, %25 : vector<4x128xf32>
    %253 = vector.extract_strided_slice %252 {offsets = [0, 0], sizes = [4, 32], strides = [1, 1]} : vector<4x128xf32> to vector<4x32xf32>
    %254 = vector.extract_strided_slice %252 {offsets = [0, 32], sizes = [4, 32], strides = [1, 1]} : vector<4x128xf32> to vector<4x32xf32>
    %255 = vector.extract_strided_slice %252 {offsets = [0, 64], sizes = [4, 32], strides = [1, 1]} : vector<4x128xf32> to vector<4x32xf32>
    %256 = vector.extract_strided_slice %252 {offsets = [0, 96], sizes = [4, 32], strides = [1, 1]} : vector<4x128xf32> to vector<4x32xf32>
    %257 = arith.mulf %254, %226 : vector<4x32xf32>
    %258 = arith.mulf %253, %255 : vector<4x32xf32>
    %259 = arith.addf %257, %258 : vector<4x32xf32>
    %260 = math.tanh %259 : vector<4x32xf32>
    %261 = arith.mulf %256, %260 : vector<4x32xf32>
    %262 = math.tanh %246 : vector<4x128xf32>
    %263 = arith.mulf %262, %22 : vector<4x128xf32>
    %264 = arith.addf %263, %25 : vector<4x128xf32>
    %265 = vector.extract_strided_slice %264 {offsets = [0, 0], sizes = [4, 32], strides = [1, 1]} : vector<4x128xf32> to vector<4x32xf32>
    %266 = vector.extract_strided_slice %264 {offsets = [0, 32], sizes = [4, 32], strides = [1, 1]} : vector<4x128xf32> to vector<4x32xf32>
    %267 = vector.extract_strided_slice %264 {offsets = [0, 64], sizes = [4, 32], strides = [1, 1]} : vector<4x128xf32> to vector<4x32xf32>
    %268 = vector.extract_strided_slice %264 {offsets = [0, 96], sizes = [4, 32], strides = [1, 1]} : vector<4x128xf32> to vector<4x32xf32>
    %269 = arith.mulf %266, %238 : vector<4x32xf32>
    %270 = arith.mulf %265, %267 : vector<4x32xf32>
    %271 = arith.addf %269, %270 : vector<4x32xf32>
    %272 = math.tanh %271 : vector<4x32xf32>
    %273 = arith.mulf %268, %272 : vector<4x32xf32>
    %274 = vector.extract_strided_slice %8 {offsets = [0, 128], sizes = [32, 128], strides = [1, 1]} : vector<32x256xf32> to vector<32x128xf32>
    %cst_35 = arith.constant dense<0.000000e+00> : vector<4x128xf32>
    %275 = tpu.matmul %261, %274, %cst_35 {dimension_numbers = #tpu.dot_dimension_numbers<[1], [0], [0], [1], [0, 0, 1, 1], [], []>} : vector<4x32xf32>, vector<32x128xf32>, vector<4x128xf32> -> vector<4x128xf32>
    %cst_36 = arith.constant dense<0.000000e+00> : vector<4x128xf32>
    %276 = tpu.matmul %273, %9, %cst_36 {dimension_numbers = #tpu.dot_dimension_numbers<[1], [0], [0], [1], [0, 0, 1, 1], [], []>} : vector<4x32xf32>, vector<32x128xf32>, vector<4x128xf32> -> vector<4x128xf32>
    %277 = arith.addf %275, %276 : vector<4x128xf32>
    %278 = arith.addf %277, %12 : vector<4x128xf32>
    %279 = math.tanh %278 : vector<4x128xf32>
    %280 = arith.mulf %279, %22 : vector<4x128xf32>
    %281 = arith.addf %280, %25 : vector<4x128xf32>
    %282 = vector.extract_strided_slice %281 {offsets = [0, 0], sizes = [4, 32], strides = [1, 1]} : vector<4x128xf32> to vector<4x32xf32>
    %283 = vector.extract_strided_slice %281 {offsets = [0, 32], sizes = [4, 32], strides = [1, 1]} : vector<4x128xf32> to vector<4x32xf32>
    %284 = vector.extract_strided_slice %281 {offsets = [0, 64], sizes = [4, 32], strides = [1, 1]} : vector<4x128xf32> to vector<4x32xf32>
    %285 = vector.extract_strided_slice %281 {offsets = [0, 96], sizes = [4, 32], strides = [1, 1]} : vector<4x128xf32> to vector<4x32xf32>
    %286 = arith.mulf %283, %271 : vector<4x32xf32>
    %287 = arith.mulf %282, %284 : vector<4x32xf32>
    %288 = arith.addf %286, %287 : vector<4x32xf32>
    %289 = math.tanh %288 : vector<4x32xf32>
    %290 = arith.mulf %285, %289 : vector<4x32xf32>
    %291 = tpu.concatenate %75, %108, %141, %174, %207, %240, %273, %290 in 0 : vector<4x32xf32>, vector<4x32xf32>, vector<4x32xf32>, vector<4x32xf32>, vector<4x32xf32>, vector<4x32xf32>, vector<4x32xf32>, vector<4x32xf32> -> vector<32x32xf32>
    %c0_37 = arith.constant 0 : index
    %c0_38 = arith.constant 0 : index
    %292 = vector.load %arg7[%c0_37, %c0_38] : memref<32x1xf32, #tpu.memory_space<vmem>>, vector<32x1xf32>
    %cst_39 = arith.constant dense<0.000000e+00> : vector<32x1xf32>
    %293 = tpu.matmul %291, %292, %cst_39 {dimension_numbers = #tpu.dot_dimension_numbers<[1], [0], [0], [1], [0, 0, 1, 1], [], []>} : vector<32x32xf32>, vector<32x1xf32>, vector<32x1xf32> -> vector<32x1xf32>
    %c0_40 = arith.constant 0 : index
    %c0_41 = arith.constant 0 : index
    %294 = vector.load %arg8[%c0_40, %c0_41] : memref<1x1xf32, #tpu.memory_space<vmem>>, vector<1x1xf32>
    %295 = vector.broadcast %294 : vector<1x1xf32> to vector<32x1xf32>
    %296 = arith.addf %293, %295 : vector<32x1xf32>
    %c0_42 = arith.constant 0 : index
    %c0_43 = arith.constant 0 : index
    %297 = vector.load %arg9[%c0_42, %c0_43] : memref<32x1xf32, #tpu.memory_space<vmem>>, vector<32x1xf32>
    tpu.vector_store %arg9[%c0_42, %c0_43], %296 {strides = array<i32>} : memref<32x1xf32, #tpu.memory_space<vmem>>, vector<32x1xf32>,
    return
  }
}

</mosaic_0001>

<bundles_post_ra>
// kernel: tpu_custom_call.1
= control target key start
LH: loop header
LB: loop body
LE: loop exit
PB: predicated region body
PF: predicated region fallthrough
CT: control target
= control target key end

     0   :  { %s1785_s0 = inlined_call_operand.hbm [shape: f32[4,16], index: 0, kind: input, shape index: {}]   ;;  %s1786_s1 = inlined_call_operand.hbm [shape: f32[16,32], index: 1, kind: input, shape index: {}]   ;;  %s1787_s2 = inlined_call_operand.vmem [shape: f32[1,32], index: 2, kind: input, shape index: {}]   ;;  %s1788_s3 = inlined_call_operand.vmem [shape: f32[8,4,128], index: 3, kind: input, shape index: {}]   ;;  %s1789_s4 = inlined_call_operand.hbm [shape: f32[32,256], index: 4, kind: input, shape index: {}]   ;;  %s1790_s5 = inlined_call_operand.hbm [shape: f32[32,128], index: 5, kind: input, shape index: {}]   ;;  %s1791_s6 = inlined_call_operand.vmem [shape: f32[1,128], index: 6, kind: input, shape index: {}]   ;;  %s1792_s7 = inlined_call_operand.vmem [shape: f32[32,1], index: 7, kind: input, shape index: {}]   ;;  %s1793_s8 = inlined_call_operand.<no memory space> [shape: f32[1,1], index: 8, kind: input, shape index: {}]   ;;  %s1794_s9 = inlined_call_operand.vmem [shape: f32[32,1], index: 9, kind: output, shape index: {}]  }
   0x1   :  { %v14_v0 = vstv %s1793_s8 }
   0x2   :  { %15 = vst [vmem:[#allocation2] sm:$0x1] %v14_v0 }
   0x3   :  { %16 = vsyncpa [#allocation4], 0 }
   0x4   :  { %17 = vsyncpa [#allocation6], 0  ;;  %s34_s13 = sshll.u32 %s1786_s1, 4  ;;  %s35_s13 = int_to_ptr.hbm [resolvable:$true] %s34_s13 }
   0x5   :  { %18 = vsyncpa [#allocation9], 0  ;;  %s1354_s14 = smov [#allocation5]   ;;  %s24_s18 = sshll.u32 %s1785_s0, 4  ;;  %s25_s18 = int_to_ptr.hbm [resolvable:$true] %s24_s18 }
   0x6   :  { %s36_s15 = sshll.u32 %s1354_s14, 4  ;;  %s1355_s19 = smov 128   ;;  %s37_s15 = int_to_ptr.vmem [resolvable:$true] %s36_s15 }
   0x7   :  { %s1356_s20 = smov 8   ;;  %s1357_s8 = smov [#allocation3]  }
   0x8   :  { %42 = dma.hbm_to_vmem [thread:$0]  %s35_s13, 256, %s37_s15, [#allocation6], %s1355_s19, %s1355_s19, %s1356_s20  }
   0x9   :  { %s26_s21 = sshll.u32 %s1357_s8, 4  ;;  %s51_s24 = sshll.u32 %s1789_s4, 4  ;;  %s27_s21 = int_to_ptr.vmem [resolvable:$true] %s26_s21  ;;  %s52_s24 = int_to_ptr.hbm [resolvable:$true] %s51_s24 }
   0xa   :  { %29 = dma.hbm_to_vmem [thread:$0]  %s25_s18, 64, %s27_s21, [#allocation4]  }
   0xb   :  { %s1358_s1 = smov [#allocation7]   ;;  %s64_s0 = sshll.u32 %s1790_s5, 4  ;;  %s65_s0 = int_to_ptr.hbm [resolvable:$true] %s64_s0 }
   0xc   :  { %s53_s25 = sshll.u32 %s1358_s1, 4  ;;  %s1359_s28 = smov 256   ;;  %s54_s25 = int_to_ptr.vmem [resolvable:$true] %s53_s25 }
   0xd   :  { %s1360_s29 = smov 16   ;;  %s1361_s30 = smov [#allocation8]  }
   0xe   :  { %59 = dma.hbm_to_vmem [thread:$0]  %s52_s24, 1024, %s54_s25, [#allocation6], %s1359_s28, %s1359_s28, %s1360_s29  }
   0xf   :  { %s66_s10 = sshll.u32 %s1361_s30, 4  ;;  %s67_s10 = int_to_ptr.vmem [resolvable:$true] %s66_s10 }
  0x10   :  { %72 = dma.hbm_to_vmem [thread:$0]  %s65_s0, 512, %s67_s10, [#allocation9], %s1355_s19, %s1355_s19, %s1356_s20  }
  0x11   :  { %1348 = dma.done.wait [#allocation4], 64  }
  0x12   :  { %1349 = vsyncadd [#allocation4], 4294967232 }
  0x13   :  { %1350 = dma.done.wait [#allocation6], 1280  }
  0x14   :  { %1351 = vsyncadd [#allocation6], 4294966016 }
  0x15   :  { %1352 = dma.done.wait [#allocation9], 512  }
  0x16   :  { %1353 = vsyncadd [#allocation9], 4294966784  ;;  %v97_v1 = vld [vmem:[#allocation5 + $0x8] sm:$0xff]  ;;  %v96_v2 = vld [vmem:[#allocation5] sm:$0xff]  ;;  %vm102_vm0 = vcmask 130048   ;;  %vm157_vm1 = vcmask 261120   ;;  %v150_v11 = vlaneseq }
  0x17   :  { %v95_v3 = vld [vmem:[#allocation3] sm:$0xf]  ;;  %120 = vmatpush.msra.mxu0 %v97_v1  ;;  %v1430_v4 = vld [vmem:[#allocation7 + $0x30] sm:$0xff]  ;;  %v1432_v5 = vld [vmem:[#allocation7 + $0x20] sm:$0xff]  ;;  %v1362_v16 = vmov 0.5   ;;  %s1364_s13 = smov 32  }
  0x18   :  { %173 = vmatpush.msra.mxu3 %v1430_v4  ;;  %326 = vmatpush.msra.mxu1 %v1430_v4  ;;  %v1440_v6 = vld [vmem:[#allocation7 + $0x10] sm:$0xff]  ;;  %v1444_v7 = vld [vmem:[#allocation7] sm:$0xff]  ;;  %v1185_v8 = vld [vmem:[%s1787_s2] ss:$0 sm:$0xff]  ;;  %v151_v12 = vand.u32 127, %v150_v11  ;;  %s1363_s2 = smov 64  }
  0x19   :  { %121 = vmatpush.msra.mxu0 %v96_v2  ;;  %v142_v13 = vld [vmem:[%s1788_s3] sm:$0xf]  ;;  %v1472_v28 = vld [vmem:[#allocation7 + $0x38] sm:$0xff]  ;;  %v1495_v35 = vld [vmem:[#allocation8 + $0x10] sm:$0xff]  ;;  %vm1067_vm5 = vcmask 1043456   ;;  %vm1129_vm6 = vcmask 7168  }
  0x1a   :  { %1141 = vmatmul.msk.f32.vlgmr.msra.gmra.mxu0 %vm102_vm0, %v95_v3  ;;  %174 = vmatpush.msra.mxu3 %v1432_v5  ;;  %vm152_vm2 = vcmp.ge.s32.totalorder %v151_v12, 64  ;;  %vm153_vm3 = vcmp.lt.s32.totalorder %v151_v12, 96  ;;  %v1474_v29 = vld [vmem:[#allocation7 + $0x28] sm:$0xff]  ;;  %v1478_v30 = vld [vmem:[#allocation7 + $0x18] sm:$0xff]  ;;  %v1504_v37 = vld [vmem:[#allocation8] sm:$0xff] }
  0x1b   :  { %218 = vmatpush.msrb.mxu0 %v1430_v4  ;;  %327 = vmatpush.msra.mxu1 %v1432_v5  ;;  %vm154_vm4 = vmand %vm152_vm2, %vm153_vm3  ;;  %v1483_v31 = vld [vmem:[#allocation7 + $0x8] sm:$0xff]  ;;  %v1493_v34 = vld [vmem:[#allocation8 + $0x18] sm:$0xff] }
  0x1c   :  { %175 = vmatpush.msra.mxu3 %v1440_v6  ;;  %v1460_v17 = vsel %vm154_vm4, 1.0, %v1362_v16  ;;  %v1462_v19 = vsel %vm154_vm4, 0.0, %v1362_v16  ;;  %346 = vmatpush.msra.mxu2 %v1472_v28  ;;  %v1499_v36 = vld [vmem:[#allocation8 + $0x8] sm:$0xff]  ;;  %v144_v11 = vld [vmem:[%s1788_s3 + $0x8] sm:$0xf] }
  0x1d   :  { %219 = vmatpush.msrb.mxu0 %v1432_v5  ;;  %328 = vmatpush.msra.mxu1 %v1440_v6  ;;  %v143_v39 = vld [vmem:[%s1788_s3 + $0x4] sm:$0xf]  ;;  %v1535_v42 = vld [vmem:[%s1791_s6] ss:$0 sm:$0xff] }
  0x1e   :  { %176 = vmatpush.msra.mxu3 %v1444_v7  ;;  %347 = vmatpush.msra.mxu2 %v1474_v29 }
  0x1f   :  { %220 = vmatpush.msrb.mxu0 %v1440_v6  ;;  %329 = vmatpush.msra.mxu1 %v1444_v7 }
  0x20   :  { %238 = vmatpush.msrb.mxu3 %v1472_v28  ;;  %348 = vmatpush.msra.mxu2 %v1478_v30 }
  0x21   :  { %221 = vmatpush.msrb.mxu0 %v1444_v7  ;;  %459 = vmatpush.msrb.mxu1 %v1472_v28 }
  0x22   :  { %239 = vmatpush.msrb.mxu3 %v1474_v29  ;;  %349 = vmatpush.msra.mxu2 %v1483_v31 }
  0x23   :  { %460 = vmatpush.msrb.mxu1 %v1474_v29  ;;  %258 = vmatpush.msra.mxu0 %v1493_v34 }
  0x24   :  { %240 = vmatpush.msrb.mxu3 %v1478_v30  ;;  %484 = vmatpush.msrb.mxu2 %v1493_v34 }
  0x25   :  { %461 = vmatpush.msrb.mxu1 %v1478_v30  ;;  %259 = vmatpush.msra.mxu0 %v1495_v35 }
  0x26   :  { %241 = vmatpush.msrb.mxu3 %v1483_v31  ;;  %485 = vmatpush.msrb.mxu2 %v1495_v35 }
  0x27   :  { %462 = vmatpush.msrb.mxu1 %v1483_v31  ;;  %260 = vmatpush.msra.mxu0 %v1499_v36 }
  0x28   :  { %486 = vmatpush.msrb.mxu2 %v1499_v36 }
  0x29   :  { %261 = vmatpush.msra.mxu0 %v1504_v37 }
  0x2a   :  { %487 = vmatpush.msrb.mxu2 %v1504_v37 }
  0x97   :  { %v123_v9 = vpop.f32.mrf.mxu0 }
  0x98   :  { %v1453_v10 = vadd.f32 %v1185_v8, %v123_v9 }
  0x9a   :  { %1142 = vmatmul.msk.f32.vlgmr.msra.gmra.mxu3 %vm157_vm1, %v1453_v10 }
  0x9b   :  { %371 = vmatpush.msra.mxu3 %v1493_v34 }
  0x9d   :  { %372 = vmatpush.msra.mxu3 %v1495_v35 }
  0x9f   :  { %373 = vmatpush.msra.mxu3 %v1499_v36 }
  0xa1   :  { %374 = vmatpush.msra.mxu3 %v1504_v37 }
 0x11d   :  { %v178_v14 = vpop.f32.mrf.mxu3 }
 0x11e   :  { %v179_v15 = vadd.f32 %v178_v14, %v142_v13 }
 0x120   :  { %1188 = vtanh.f32 %v179_v15 }
 0x126   :  { %v1189_v18 = vpop.eup %1188 }
 0x127   :  { %v182_v20 = vmul.f32 %v1189_v18, %v1460_v17 }
 0x129   :  { %v183_v21 = vadd.f32 %v182_v20, %v1462_v19 }
 0x12b   :  { %186 = vrot.lane.b32.xlu0 %v183_v21, %s1363_s2  ;;  %v184_v24 = vmul.f32 0.0, %v183_v21 }
 0x19d   :  { %v187_v22 = vpop.permute.xlu0 %186 }
 0x19e   :  { %v189_v23 = vmul.f32 %v187_v22, %v183_v21 }
 0x1a0   :  { %191 = vrot.lane.b32.xlu0 %v189_v23, %s1364_s13 }
 0x212   :  { %v192_v25 = vpop.permute.xlu0 %191 }
 0x213   :  { %v1468_v26 = vadd.f32 %v192_v25, %v184_v24 }
 0x215   :  { %1190 = vtanh.f32 %v1468_v26 }
 0x21b   :  { %v1191_v27 = vpop.eup %1190 }
 0x21c   :  { %197 = vrot.lane.b32.xlu1 %v1191_v27, %s1363_s2 }
 0x28e   :  { %v198_v32 = vpop.permute.xlu1 %197 }
 0x28f   :  { %v200_v33 = vmul.f32 %v198_v32, %v183_v21 }
 0x291   :  { %202 = vrot.lane.b32.xlu1 %v200_v33, %s1364_s13 }
 0x303   :  { %v203_v38 = vpop.permute.xlu1 %202 }
 0x304   :  { %1143 = vmatmul.msk.f32.vlgmr.msrb.gmra.mxu0 %vm157_vm1, %v203_v38  ;;  %1144 = vmatmul.msk.f32.vlgmr.msrb.gmra.mxu3 %vm157_vm1, %v203_v38 }
 0x305   :  { %439 = vmatpush.msrb.mxu0 %v1430_v4  ;;  %552 = vmatpush.msrb.mxu3 %v1430_v4 }
 0x307   :  { %440 = vmatpush.msrb.mxu0 %v1432_v5  ;;  %553 = vmatpush.msrb.mxu3 %v1432_v5 }
 0x309   :  { %441 = vmatpush.msrb.mxu0 %v1440_v6  ;;  %554 = vmatpush.msrb.mxu3 %v1440_v6 }
 0x30b   :  { %442 = vmatpush.msrb.mxu0 %v1444_v7  ;;  %555 = vmatpush.msrb.mxu3 %v1444_v7 }
 0x30c   :  { %1145 = vmatmul.msk.f32.vlgmr.msra.gmra.mxu0 %vm157_vm1, %v1453_v10 }
 0x30d   :  { %572 = vmatpush.msra.mxu0 %v1472_v28 }
 0x30f   :  { %573 = vmatpush.msra.mxu0 %v1474_v29 }
 0x311   :  { %574 = vmatpush.msra.mxu0 %v1478_v30 }
 0x313   :  { %575 = vmatpush.msra.mxu0 %v1483_v31 }
 0x381   :  { %v223_v40 = vpop.f32.mrf.mxu0 }
 0x382   :  { %v268_v41 = vadd.f32 %v223_v40, %v143_v39 }
 0x384   :  { %1192 = vtanh.f32 %v268_v41 }
 0x387   :  { %v243_v43 = vpop.f32.mrf.mxu3 }
 0x389   :  { %v263_v44 = vpop.f32.mrf.mxu0 }
 0x38a   :  { %v1193_v45 = vpop.eup %1192  ;;  %v266_v46 = vadd.f32 %v263_v44, %v243_v43 }
 0x38b   :  { %v270_v47 = vmul.f32 %v1193_v45, %v1460_v17 }
 0x38c   :  { %v267_v48 = vadd.f32 %v1535_v42, %v266_v46 }
 0x38d   :  { %v271_v49 = vadd.f32 %v270_v47, %v1462_v19 }
 0x38e   :  { %1194 = vtanh.f32 %v267_v48 }
 0x38f   :  { %274 = vrot.lane.b32.xlu2 %v271_v49, %s1363_s2  ;;  %v272_v57 = vmul.f32 %v271_v49, %v1468_v26 }
 0x394   :  { %v1195_v50 = vpop.eup %1194 }
 0x395   :  { %v290_v51 = vmul.f32 %v1195_v50, %v1460_v17 }
 0x397   :  { %v291_v52 = vadd.f32 %v290_v51, %v1462_v19 }
 0x399   :  { %294 = vrot.lane.b32.xlu2 %v291_v52, %s1363_s2  ;;  %v292_v61 = vmul.f32 0.0, %v291_v52 }
 0x3e9   :  { %v275_v53 = vpop.permute.xlu2 %274 }
 0x3ea   :  { %v277_v54 = vmul.f32 %v275_v53, %v271_v49  ;;  %v145_v53 = vld [vmem:[%s1788_s3 + $0xc] sm:$0xf] }
 0x3ec   :  { %279 = vrot.lane.b32.xlu0 %v277_v54, %s1364_s13 }
 0x3f3   :  { %v295_v55 = vpop.permute.xlu2 %294 }
 0x3f4   :  { %v297_v56 = vmul.f32 %v295_v55, %v291_v52 }
 0x3f6   :  { %299 = vrot.lane.b32.xlu1 %v297_v56, %s1364_s13 }
 0x45e   :  { %v280_v58 = vpop.permute.xlu0 %279 }
 0x45f   :  { %v282_v59 = vadd.f32 %v280_v58, %v272_v57 }
 0x461   :  { %1196 = vtanh.f32 %v282_v59 }
 0x467   :  { %v1197_v60 = vpop.eup %1196 }
 0x468   :  { %285 = vrot.lane.b32.xlu2 %v1197_v60, %s1363_s2  ;;  %v300_v62 = vpop.permute.xlu1 %299 }
 0x469   :  { %v302_v63 = vadd.f32 %v300_v62, %v292_v61 }
 0x46b   :  { %1198 = vtanh.f32 %v302_v63 }
 0x471   :  { %v1199_v0 = vpop.eup %1198 }
 0x472   :  { %305 = vrot.lane.b32.xlu0 %v1199_v0, %s1363_s2 }
 0x4c2   :  { %v286_v1 = vpop.permute.xlu2 %285 }
 0x4c3   :  { %v288_v2 = vmul.f32 %v286_v1, %v271_v49 }
 0x4c5   :  { %310 = vrot.lane.b32.xlu1 %v288_v2, %s1364_s13 }
 0x4e4   :  { %v306_v3 = vpop.permute.xlu0 %305 }
 0x4e5   :  { %v1550_v8 = vmul.f32 %v306_v3, %v291_v52 }
 0x4e7   :  { %355 = vrot.lane.b32.xlu2 %v1550_v8, %s1364_s13 }
 0x537   :  { %v311_v9 = vpop.permute.xlu1 %310 }
 0x538   :  { %1146 = vmatmul.msk.f32.vlgmr.msra.gmra.mxu1 %vm157_vm1, %v311_v9  ;;  %1147 = vmatmul.msk.f32.vlgmr.msra.gmra.mxu2 %vm157_vm1, %v311_v9 }
 0x539   :  { %597 = vmatpush.msra.mxu1 %v1493_v34  ;;  %665 = vmatpush.msra.mxu2 %v1430_v4 }
 0x53b   :  { %598 = vmatpush.msra.mxu1 %v1495_v35  ;;  %666 = vmatpush.msra.mxu2 %v1432_v5 }
 0x53d   :  { %599 = vmatpush.msra.mxu1 %v1499_v36  ;;  %667 = vmatpush.msra.mxu2 %v1440_v6 }
 0x53f   :  { %600 = vmatpush.msra.mxu1 %v1504_v37  ;;  %668 = vmatpush.msra.mxu2 %v1444_v7 }
 0x541   :  { %v356_v10 = vpop.permute.xlu2 %355 }
 0x542   :  { %1148 = vmatmul.msk.f32.vlgmr.msra.gmra.mxu3 %vm157_vm1, %v356_v10 }
 0x543   :  { %685 = vmatpush.msra.mxu3 %v1472_v28 }
 0x545   :  { %686 = vmatpush.msra.mxu3 %v1474_v29 }
 0x547   :  { %687 = vmatpush.msra.mxu3 %v1478_v30 }
 0x549   :  { %688 = vmatpush.msra.mxu3 %v1483_v31 }
 0x5b5   :  { %v331_v12 = vpop.f32.mrf.mxu1 }
 0x5b6   :  { %v381_v13 = vadd.f32 %v331_v12, %v144_v11 }
 0x5b8   :  { %1200 = vtanh.f32 %v381_v13 }
 0x5bb   :  { %v351_v18 = vpop.f32.mrf.mxu2 }
 0x5be   :  { %v1201_v14 = vpop.eup %1200 }
 0x5bf   :  { %v383_v15 = vmul.f32 %v1201_v14, %v1460_v17 }
 0x5c1   :  { %v384_v16 = vadd.f32 %v383_v15, %v1462_v19 }
 0x5c3   :  { %387 = vrot.lane.b32.xlu0 %v384_v16, %s1363_s2  ;;  %v385_v38 = vmul.f32 %v384_v16, %v282_v59 }
 0x5c5   :  { %v376_v20 = vpop.f32.mrf.mxu3 }
 0x5c6   :  { %v379_v21 = vadd.f32 %v376_v20, %v351_v18 }
 0x5c8   :  { %v380_v22 = vadd.f32 %v1535_v42, %v379_v21 }
 0x5ca   :  { %1202 = vtanh.f32 %v380_v22 }
 0x5d0   :  { %v1203_v23 = vpop.eup %1202 }
 0x5d1   :  { %v403_v24 = vmul.f32 %v1203_v23, %v1460_v17 }
 0x5d3   :  { %v404_v25 = vadd.f32 %v403_v24, %v1462_v19 }
 0x5d5   :  { %407 = vrot.lane.b32.xlu1 %v404_v25, %s1363_s2  ;;  %v405_v43 = vmul.f32 %v404_v25, %v302_v63 }
 0x635   :  { %v388_v26 = vpop.permute.xlu0 %387 }
 0x636   :  { %v390_v27 = vmul.f32 %v388_v26, %v384_v16 }
 0x638   :  { %392 = vrot.lane.b32.xlu2 %v390_v27, %s1364_s13 }
 0x647   :  { %v408_v32 = vpop.permute.xlu1 %407 }
 0x648   :  { %v410_v33 = vmul.f32 %v408_v32, %v404_v25 }
 0x64a   :  { %412 = vrot.lane.b32.xlu0 %v410_v33, %s1364_s13 }
 0x692   :  { %v393_v39 = vpop.permute.xlu2 %392 }
 0x693   :  { %v395_v40 = vadd.f32 %v393_v39, %v385_v38 }
 0x695   :  { %1204 = vtanh.f32 %v395_v40 }
 0x69b   :  { %v1205_v41 = vpop.eup %1204 }
 0x69c   :  { %398 = vrot.lane.b32.xlu1 %v1205_v41, %s1363_s2 }
 0x6bc   :  { %v413_v44 = vpop.permute.xlu0 %412 }
 0x6bd   :  { %v415_v45 = vadd.f32 %v413_v44, %v405_v43 }
 0x6bf   :  { %1206 = vtanh.f32 %v415_v45 }
 0x6c5   :  { %v1207_v46 = vpop.eup %1206 }
 0x6c6   :  { %418 = vrot.lane.b32.xlu2 %v1207_v46, %s1363_s2 }
 0x70e   :  { %v399_v47 = vpop.permute.xlu1 %398 }
 0x70f   :  { %v401_v48 = vmul.f32 %v399_v47, %v384_v16 }
 0x711   :  { %423 = vrot.lane.b32.xlu0 %v401_v48, %s1364_s13 }
 0x720   :  { %v419_v49 = vpop.permute.xlu2 %418 }
 0x721   :  { %v1584_v50 = vmul.f32 %v419_v49, %v404_v25 }
 0x723   :  { %468 = vrot.lane.b32.xlu1 %v1584_v50, %s1364_s13 }
 0x783   :  { %v424_v51 = vpop.permute.xlu0 %423 }
 0x784   :  { %1149 = vmatmul.msk.f32.vlgmr.msrb.gmra.mxu0 %vm157_vm1, %v424_v51  ;;  %1150 = vmatmul.msk.f32.vlgmr.msrb.gmra.mxu1 %vm157_vm1, %v424_v51 }
 0x785   :  { %710 = vmatpush.msrb.mxu0 %v1493_v34  ;;  %778 = vmatpush.msrb.mxu1 %v1430_v4 }
 0x787   :  { %711 = vmatpush.msrb.mxu0 %v1495_v35  ;;  %779 = vmatpush.msrb.mxu1 %v1432_v5 }
 0x789   :  { %712 = vmatpush.msrb.mxu0 %v1499_v36  ;;  %780 = vmatpush.msrb.mxu1 %v1440_v6 }
 0x78b   :  { %713 = vmatpush.msrb.mxu0 %v1504_v37  ;;  %781 = vmatpush.msrb.mxu1 %v1444_v7 }
 0x795   :  { %v469_v52 = vpop.permute.xlu1 %468 }
 0x796   :  { %1151 = vmatmul.msk.f32.vlgmr.msrb.gmra.mxu2 %vm157_vm1, %v469_v52 }
 0x797   :  { %798 = vmatpush.msrb.mxu2 %v1472_v28 }
 0x799   :  { %799 = vmatpush.msrb.mxu2 %v1474_v29 }
 0x79b   :  { %800 = vmatpush.msrb.mxu2 %v1478_v30 }
 0x79d   :  { %801 = vmatpush.msrb.mxu2 %v1483_v31 }
 0x801   :  { %v444_v54 = vpop.f32.mrf.mxu0  ;;  %v464_v59 = vpop.f32.mrf.mxu1 }
 0x802   :  { %v494_v55 = vadd.f32 %v444_v54, %v145_v53 }
 0x804   :  { %1208 = vtanh.f32 %v494_v55 }
 0x80a   :  { %v1209_v56 = vpop.eup %1208 }
 0x80b   :  { %v496_v57 = vmul.f32 %v1209_v56, %v1460_v17 }
 0x80d   :  { %v497_v58 = vadd.f32 %v496_v57, %v1462_v19 }
 0x80f   :  { %500 = vrot.lane.b32.xlu2 %v497_v58, %s1363_s2  ;;  %v498_v11 = vmul.f32 %v497_v58, %v395_v40 }
 0x819   :  { %v489_v60 = vpop.f32.mrf.mxu2 }
 0x81a   :  { %v492_v61 = vadd.f32 %v489_v60, %v464_v59 }
 0x81c   :  { %v493_v62 = vadd.f32 %v1535_v42, %v492_v61 }
 0x81e   :  { %1210 = vtanh.f32 %v493_v62 }
 0x824   :  { %v1211_v63 = vpop.eup %1210 }
 0x825   :  { %v516_v0 = vmul.f32 %v1211_v63, %v1460_v17 }
 0x827   :  { %v517_v1 = vadd.f32 %v516_v0, %v1462_v19 }
 0x829   :  { %520 = vrot.lane.b32.xlu0 %v517_v1, %s1363_s2  ;;  %v518_v15 = vmul.f32 %v517_v1, %v415_v45 }
 0x869   :  { %v501_v2 = vpop.permute.xlu2 %500 }
 0x86a   :  { %v503_v3 = vmul.f32 %v501_v2, %v497_v58 }
 0x86c   :  { %505 = vrot.lane.b32.xlu1 %v503_v3, %s1364_s13 }
 0x89b   :  { %v521_v9 = vpop.permute.xlu0 %520 }
 0x89c   :  { %v523_v10 = vmul.f32 %v521_v9, %v517_v1 }
 0x89e   :  { %525 = vrot.lane.b32.xlu2 %v523_v10, %s1364_s13 }
 0x8de   :  { %v506_v12 = vpop.permute.xlu1 %505 }
 0x8df   :  { %v508_v13 = vadd.f32 %v506_v12, %v498_v11 }
 0x8e1   :  { %1212 = vtanh.f32 %v508_v13 }
 0x8e7   :  { %v1213_v14 = vpop.eup %1212 }
 0x8e8   :  { %511 = vrot.lane.b32.xlu0 %v1213_v14, %s1363_s2 }
 0x8f8   :  { %v526_v16 = vpop.permute.xlu2 %525 }
 0x8f9   :  { %v528_v18 = vadd.f32 %v526_v16, %v518_v15 }
 0x8fb   :  { %1214 = vtanh.f32 %v528_v18 }
 0x901   :  { %v1215_v20 = vpop.eup %1214 }
 0x902   :  { %531 = vrot.lane.b32.xlu1 %v1215_v20, %s1363_s2 }
 0x95a   :  { %v512_v21 = vpop.permute.xlu0 %511 }
 0x95b   :  { %v514_v22 = vmul.f32 %v512_v21, %v497_v58 }
 0x95d   :  { %536 = vrot.lane.b32.xlu2 %v514_v22, %s1364_s13 }
 0x974   :  { %v532_v23 = vpop.permute.xlu1 %531 }
 0x975   :  { %v1618_v24 = vmul.f32 %v532_v23, %v517_v1 }
 0x977   :  { %581 = vrot.lane.b32.xlu0 %v1618_v24, %s1364_s13 }
 0x9b7   :  { %v537_v25 = vpop.permute.xlu2 %536 }
 0x9b8   :  { %1152 = vmatmul.msk.f32.vlgmr.msrb.gmra.mxu3 %vm157_vm1, %v537_v25  ;;  %1153 = vmatmul.msk.f32.vlgmr.msra.gmra.mxu0 %vm157_vm1, %v537_v25 }
 0x9b9   :  { %823 = vmatpush.msrb.mxu3 %v1493_v34  ;;  %891 = vmatpush.msra.mxu0 %v1430_v4  ;;  %v146_v4 = vld [vmem:[%s1788_s3 + $0x10] sm:$0xf] }
 0x9bb   :  { %824 = vmatpush.msrb.mxu3 %v1495_v35  ;;  %892 = vmatpush.msra.mxu0 %v1432_v5 }
 0x9bd   :  { %825 = vmatpush.msrb.mxu3 %v1499_v36  ;;  %893 = vmatpush.msra.mxu0 %v1440_v6 }
 0x9bf   :  { %826 = vmatpush.msrb.mxu3 %v1504_v37  ;;  %894 = vmatpush.msra.mxu0 %v1444_v7 }
 0x9e9   :  { %v582_v26 = vpop.permute.xlu0 %581 }
 0x9ea   :  { %1154 = vmatmul.msk.f32.vlgmr.msra.gmra.mxu1 %vm157_vm1, %v582_v26 }
 0x9eb   :  { %911 = vmatpush.msra.mxu1 %v1472_v28 }
 0x9ed   :  { %912 = vmatpush.msra.mxu1 %v1474_v29 }
 0x9ef   :  { %913 = vmatpush.msra.mxu1 %v1478_v30 }
 0x9f1   :  { %914 = vmatpush.msra.mxu1 %v1483_v31 }
 0xa35   :  { %v577_v33 = vpop.f32.mrf.mxu0 }
 0xa3b   :  { %v557_v5 = vpop.f32.mrf.mxu3 }
 0xa3c   :  { %v607_v6 = vadd.f32 %v557_v5, %v146_v4 }
 0xa3e   :  { %1216 = vtanh.f32 %v607_v6 }
 0xa44   :  { %v1217_v27 = vpop.eup %1216 }
 0xa45   :  { %v609_v7 = vmul.f32 %v1217_v27, %v1460_v17 }
 0xa47   :  { %v610_v32 = vadd.f32 %v609_v7, %v1462_v19  ;;  %v148_v7 = vld [vmem:[%s1788_s3 + $0x18] sm:$0xf] }
 0xa49   :  { %613 = vrot.lane.b32.xlu1 %v610_v32, %s1363_s2  ;;  %v611_v49 = vmul.f32 %v610_v32, %v508_v13 }
 0xa67   :  { %v602_v38 = vpop.f32.mrf.mxu1 }
 0xa68   :  { %v605_v39 = vadd.f32 %v602_v38, %v577_v33 }
 0xa6a   :  { %v606_v40 = vadd.f32 %v1535_v42, %v605_v39 }
 0xa6c   :  { %1218 = vtanh.f32 %v606_v40 }
 0xa72   :  { %v1219_v41 = vpop.eup %1218 }
 0xa73   :  { %v629_v43 = vmul.f32 %v1219_v41, %v1460_v17 }
 0xa75   :  { %v630_v44 = vadd.f32 %v629_v43, %v1462_v19 }
 0xa77   :  { %633 = vrot.lane.b32.xlu2 %v630_v44, %s1363_s2  ;;  %v631_v54 = vmul.f32 %v630_v44, %v528_v18 }
 0xabb   :  { %v614_v45 = vpop.permute.xlu1 %613 }
 0xabc   :  { %v616_v46 = vmul.f32 %v614_v45, %v610_v32 }
 0xabe   :  { %618 = vrot.lane.b32.xlu0 %v616_v46, %s1364_s13 }
 0xad1   :  { %v634_v47 = vpop.permute.xlu2 %633 }
 0xad2   :  { %v636_v48 = vmul.f32 %v634_v47, %v630_v44 }
 0xad4   :  { %638 = vrot.lane.b32.xlu1 %v636_v48, %s1364_s13 }
 0xb30   :  { %v619_v51 = vpop.permute.xlu0 %618 }
 0xb31   :  { %v621_v52 = vadd.f32 %v619_v51, %v611_v49 }
 0xb33   :  { %1220 = vtanh.f32 %v621_v52 }
 0xb39   :  { %v1221_v53 = vpop.eup %1220 }
 0xb3a   :  { %624 = vrot.lane.b32.xlu2 %v1221_v53, %s1363_s2 }
 0xb46   :  { %v639_v55 = vpop.permute.xlu1 %638 }
 0xb47   :  { %v641_v56 = vadd.f32 %v639_v55, %v631_v54 }
 0xb49   :  { %1222 = vtanh.f32 %v641_v56 }
 0xb4f   :  { %v1223_v57 = vpop.eup %1222 }
 0xb50   :  { %644 = vrot.lane.b32.xlu0 %v1223_v57, %s1363_s2 }
 0xb94   :  { %v625_v58 = vpop.permute.xlu2 %624 }
 0xb95   :  { %v627_v59 = vmul.f32 %v625_v58, %v610_v32 }
 0xb97   :  { %649 = vrot.lane.b32.xlu1 %v627_v59, %s1364_s13 }
 0xbc2   :  { %v645_v60 = vpop.permute.xlu0 %644 }
 0xbc3   :  { %v1652_v61 = vmul.f32 %v645_v60, %v630_v44 }
 0xbc5   :  { %694 = vrot.lane.b32.xlu2 %v1652_v61, %s1364_s13 }
 0xc09   :  { %v650_v62 = vpop.permute.xlu1 %649 }
 0xc0a   :  { %1155 = vmatmul.msk.f32.vlgmr.msra.gmra.mxu2 %vm157_vm1, %v650_v62  ;;  %1156 = vmatmul.msk.f32.vlgmr.msra.gmra.mxu3 %vm157_vm1, %v650_v62 }
 0xc0b   :  { %936 = vmatpush.msra.mxu2 %v1493_v34  ;;  %1004 = vmatpush.msra.mxu3 %v1493_v34  ;;  %v147_v34 = vld [vmem:[%s1788_s3 + $0x14] sm:$0xf] }
 0xc0d   :  { %937 = vmatpush.msra.mxu2 %v1495_v35  ;;  %1005 = vmatpush.msra.mxu3 %v1495_v35 }
 0xc0f   :  { %938 = vmatpush.msra.mxu2 %v1499_v36  ;;  %1006 = vmatpush.msra.mxu3 %v1499_v36 }
 0xc11   :  { %939 = vmatpush.msra.mxu2 %v1504_v37  ;;  %1007 = vmatpush.msra.mxu3 %v1504_v37 }
 0xc1f   :  { %v695_v63 = vpop.permute.xlu2 %694 }
 0xc20   :  { %1157 = vmatmul.msk.f32.vlgmr.msrb.gmra.mxu0 %vm157_vm1, %v695_v63 }
 0xc21   :  { %1029 = vmatpush.msrb.mxu0 %v1472_v28 }
 0xc23   :  { %1030 = vmatpush.msrb.mxu0 %v1474_v29 }
 0xc25   :  { %1031 = vmatpush.msrb.mxu0 %v1478_v30 }
 0xc27   :  { %1032 = vmatpush.msrb.mxu0 %v1483_v31 }
 0xc8d   :  { %v670_v35 = vpop.f32.mrf.mxu2  ;;  %v690_v28 = vpop.f32.mrf.mxu3 }
 0xc8e   :  { %v720_v36 = vadd.f32 %v670_v35, %v147_v34 }
 0xc90   :  { %1224 = vtanh.f32 %v720_v36 }
 0xc96   :  { %v1225_v0 = vpop.eup %1224 }
 0xc97   :  { %v722_v37 = vmul.f32 %v1225_v0, %v1460_v17 }
 0xc99   :  { %v723_v1 = vadd.f32 %v722_v37, %v1462_v19 }
 0xc9b   :  { %726 = vrot.lane.b32.xlu0 %v723_v1, %s1363_s2  ;;  %v724_v14 = vmul.f32 %v723_v1, %v621_v52 }
 0xc9d   :  { %v715_v29 = vpop.f32.mrf.mxu0 }
 0xc9e   :  { %v718_v2 = vadd.f32 %v715_v29, %v690_v28 }
 0xca0   :  { %v719_v30 = vadd.f32 %v1535_v42, %v718_v2 }
 0xca2   :  { %1226 = vtanh.f32 %v719_v30 }
 0xca8   :  { %v1227_v31 = vpop.eup %1226 }
 0xca9   :  { %v742_v3 = vmul.f32 %v1227_v31, %v1460_v17 }
 0xcab   :  { %v743_v9 = vadd.f32 %v742_v3, %v1462_v19 }
 0xcad   :  { %746 = vrot.lane.b32.xlu1 %v743_v9, %s1363_s2  ;;  %v744_v20 = vmul.f32 %v743_v9, %v641_v56 }
 0xd0d   :  { %v727_v10 = vpop.permute.xlu0 %726 }
 0xd0e   :  { %v729_v11 = vmul.f32 %v727_v10, %v723_v1 }
 0xd10   :  { %731 = vrot.lane.b32.xlu2 %v729_v11, %s1364_s13 }
 0xd1f   :  { %v747_v12 = vpop.permute.xlu1 %746 }
 0xd20   :  { %v749_v13 = vmul.f32 %v747_v12, %v743_v9 }
 0xd22   :  { %751 = vrot.lane.b32.xlu0 %v749_v13, %s1364_s13 }
 0xd6a   :  { %v732_v15 = vpop.permute.xlu2 %731 }
 0xd6b   :  { %v734_v16 = vadd.f32 %v732_v15, %v724_v14 }
 0xd6d   :  { %1228 = vtanh.f32 %v734_v16 }
 0xd73   :  { %v1229_v18 = vpop.eup %1228 }
 0xd74   :  { %737 = vrot.lane.b32.xlu1 %v1229_v18, %s1363_s2 }
 0xd94   :  { %v752_v21 = vpop.permute.xlu0 %751 }
 0xd95   :  { %v754_v22 = vadd.f32 %v752_v21, %v744_v20 }
 0xd97   :  { %1230 = vtanh.f32 %v754_v22 }
 0xd9d   :  { %v1231_v23 = vpop.eup %1230 }
 0xd9e   :  { %757 = vrot.lane.b32.xlu2 %v1231_v23, %s1363_s2 }
 0xde6   :  { %v738_v25 = vpop.permute.xlu1 %737 }
 0xde7   :  { %v740_v26 = vmul.f32 %v738_v25, %v723_v1  ;;  %v149_v1 = vld [vmem:[%s1788_s3 + $0x1c] sm:$0xf] }
 0xde9   :  { %762 = vrot.lane.b32.xlu0 %v740_v26, %s1364_s13 }
 0xdf8   :  { %v758_v4 = vpop.permute.xlu2 %757 }
 0xdf9   :  { %v1686_v5 = vmul.f32 %v758_v4, %v743_v9 }
 0xdfb   :  { %807 = vrot.lane.b32.xlu1 %v1686_v5, %s1364_s13 }
 0xe5b   :  { %v763_v6 = vpop.permute.xlu0 %762 }
 0xe5c   :  { %1158 = vmatmul.msk.f32.vlgmr.msrb.gmra.mxu1 %vm157_vm1, %v763_v6  ;;  %1159 = vmatmul.msk.f32.vlgmr.msrb.gmra.mxu2 %vm157_vm1, %v763_v6 }
 0xe6d   :  { %v808_v27 = vpop.permute.xlu1 %807 }
 0xe6e   :  { %1160 = vmatmul.msk.f32.vlgmr.msrb.gmra.mxu3 %vm157_vm1, %v808_v27 }
 0xed9   :  { %v783_v32 = vpop.f32.mrf.mxu1 }
 0xeda   :  { %v833_v33 = vadd.f32 %v783_v32, %v148_v7 }
 0xedc   :  { %1232 = vtanh.f32 %v833_v33 }
 0xedf   :  { %v803_v41 = vpop.f32.mrf.mxu2 }
 0xee2   :  { %v1233_v38 = vpop.eup %1232 }
 0xee3   :  { %v835_v39 = vmul.f32 %v1233_v38, %v1460_v17 }
 0xee5   :  { %v836_v40 = vadd.f32 %v835_v39, %v1462_v19 }
 0xee7   :  { %839 = vrot.lane.b32.xlu0 %v836_v40, %s1363_s2  ;;  %v837_v54 = vmul.f32 %v836_v40, %v734_v16 }
 0xef1   :  { %v828_v43 = vpop.f32.mrf.mxu3 }
 0xef2   :  { %v831_v44 = vadd.f32 %v828_v43, %v803_v41 }
 0xef4   :  { %v832_v45 = vadd.f32 %v1535_v42, %v831_v44 }
 0xef6   :  { %1234 = vtanh.f32 %v832_v45 }
 0xefc   :  { %v1235_v46 = vpop.eup %1234 }
 0xefd   :  { %v855_v47 = vmul.f32 %v1235_v46, %v1460_v17 }
 0xeff   :  { %v856_v48 = vadd.f32 %v855_v47, %v1462_v19 }
 0xf01   :  { %859 = vrot.lane.b32.xlu2 %v856_v48, %s1363_s2  ;;  %v857_v58 = vmul.f32 %v856_v48, %v754_v22 }
 0xf59   :  { %v840_v49 = vpop.permute.xlu0 %839 }
 0xf5a   :  { %v842_v51 = vmul.f32 %v840_v49, %v836_v40 }
 0xf5b   :  { %v860_v52 = vpop.permute.xlu2 %859 }
 0xf5c   :  { %v862_v53 = vmul.f32 %v860_v52, %v856_v48  ;;  %844 = vrot.lane.b32.xlu2 %v842_v51, %s1364_s13  ;;  %v1060_v52 = vrot.slane %v1652_v61, 4 }
 0xf5e   :  { %864 = vrot.lane.b32.xlu1 %v862_v53, %s1364_s13 }
 0xfb6   :  { %v845_v55 = vpop.permute.xlu2 %844 }
 0xfb7   :  { %v847_v56 = vadd.f32 %v845_v55, %v837_v54  ;;  %v1058_v54 = vrot.slane %v1584_v50, 4  ;;  %v1187_v50 = vld [vmem:[#allocation2] ss:$0 sm:$0xff] }
 0xfb9   :  { %1236 = vtanh.f32 %v847_v56 }
 0xfbf   :  { %v1237_v57 = vpop.eup %1236 }
 0xfc0   :  { %850 = vrot.lane.b32.xlu1 %v1237_v57, %s1363_s2 }
 0xfd0   :  { %v865_v59 = vpop.permute.xlu1 %864 }
 0xfd1   :  { %v867_v60 = vadd.f32 %v865_v59, %v857_v58 }
 0xfd3   :  { %1238 = vtanh.f32 %v867_v60 }
 0xfd9   :  { %v1239_v62 = vpop.eup %1238 }
 0xfda   :  { %870 = vrot.lane.b32.xlu0 %v1239_v62, %s1363_s2 }
0x1032   :  { %v851_v63 = vpop.permute.xlu1 %850 }
0x1033   :  { %v853_v34 = vmul.f32 %v851_v63, %v836_v40 }
0x1035   :  { %875 = vrot.lane.b32.xlu0 %v853_v34, %s1364_s13 }
0x104c   :  { %v871_v35 = vpop.permute.xlu0 %870 }
0x104d   :  { %v1708_v36 = vmul.f32 %v871_v35, %v856_v48 }
0x104f   :  { %920 = vrot.lane.b32.xlu2 %v1708_v36, %s1364_s13  ;;  %v1062_v49 = vrot.slane %v1708_v36, 4 }
0x1051   :  { %v1070_v51 = vsel %vm1067_vm5, %v1686_v5, %v1062_v49  ;;  %v1073_v5 = vld [vmem:[%s1792_s7 + $0x8] sm:$0xff] }
0x10a7   :  { %v876_v0 = vpop.permute.xlu0 %875 }
0x10a8   :  { %1161 = vmatmul.msk.f32.vlgmr.msra.gmra.mxu0 %vm157_vm1, %v876_v0  ;;  %1162 = vmatmul.msk.f32.vlgmr.msra.gmra.mxu1 %vm157_vm1, %v876_v0 }
0x10a9   :  { %v921_v37 = vpop.permute.xlu2 %920 }
0x10aa   :  { %1163 = vmatmul.msk.f32.vlgmr.msra.gmra.mxu2 %vm157_vm1, %v921_v37 }
0x1125   :  { %v896_v28 = vpop.f32.mrf.mxu0  ;;  %v916_v2 = vpop.f32.mrf.mxu1 }
0x1126   :  { %v946_v29 = vadd.f32 %v896_v28, %v149_v1 }
0x1128   :  { %1240 = vtanh.f32 %v946_v29 }
0x112d   :  { %v941_v30 = vpop.f32.mrf.mxu2 }
0x112e   :  { %v1241_v31 = vpop.eup %1240  ;;  %v944_v3 = vadd.f32 %v941_v30, %v916_v2 }
0x112f   :  { %v948_v9 = vmul.f32 %v1241_v31, %v1460_v17 }
0x1130   :  { %v945_v10 = vadd.f32 %v1535_v42, %v944_v3 }
0x1131   :  { %v949_v11 = vadd.f32 %v948_v9, %v1462_v19 }
0x1132   :  { %1242 = vtanh.f32 %v945_v10 }
0x1133   :  { %952 = vrot.lane.b32.xlu2 %v949_v11, %s1363_s2  ;;  %v950_v21 = vmul.f32 %v949_v11, %v847_v56  ;;  %v1068_v56 = vsel %vm1067_vm5, %v1550_v8, %v1058_v54 }
0x1138   :  { %v1243_v12 = vpop.eup %1242 }
0x1139   :  { %v968_v13 = vmul.f32 %v1243_v12, %v1460_v17 }
0x113b   :  { %v969_v14 = vadd.f32 %v968_v13, %v1462_v19 }
0x113d   :  { %972 = vrot.lane.b32.xlu1 %v969_v14, %s1363_s2  ;;  %v970_v26 = vmul.f32 %v969_v14, %v867_v60 }
0x118d   :  { %v953_v15 = vpop.permute.xlu2 %952 }
0x118e   :  { %v955_v16 = vmul.f32 %v953_v15, %v949_v11 }
0x1190   :  { %957 = vrot.lane.b32.xlu1 %v955_v16, %s1364_s13 }
0x11af   :  { %v973_v18 = vpop.permute.xlu1 %972 }
0x11b0   :  { %v975_v20 = vmul.f32 %v973_v18, %v969_v14 }
0x11b2   :  { %977 = vrot.lane.b32.xlu0 %v975_v20, %s1364_s13 }
0x1202   :  { %v958_v22 = vpop.permute.xlu1 %957 }
0x1203   :  { %v960_v23 = vadd.f32 %v958_v22, %v950_v21 }
0x1205   :  { %1244 = vtanh.f32 %v960_v23 }
0x120b   :  { %v1245_v25 = vpop.eup %1244 }
0x120c   :  { %963 = vrot.lane.b32.xlu0 %v1245_v25, %s1363_s2 }
0x1224   :  { %v978_v4 = vpop.permute.xlu0 %977 }
0x1225   :  { %v980_v6 = vadd.f32 %v978_v4, %v970_v26 }
0x1227   :  { %1246 = vtanh.f32 %v980_v6 }
0x122d   :  { %v1247_v27 = vpop.eup %1246 }
0x122e   :  { %983 = vrot.lane.b32.xlu2 %v1247_v27, %s1363_s2 }
0x127e   :  { %v964_v7 = vpop.permute.xlu0 %963 }
0x127f   :  { %v966_v32 = vmul.f32 %v964_v7, %v949_v11 }
0x1281   :  { %1013 = vrot.lane.b32.xlu2 %v966_v32, %s1364_s13 }
0x1288   :  { %v984_v33 = vpop.permute.xlu2 %983 }
0x1289   :  { %v986_v38 = vmul.f32 %v984_v33, %v969_v14 }
0x128b   :  { %988 = vrot.lane.b32.xlu1 %v986_v38, %s1364_s13 }
0x12db   :  { %v1014_v39 = vpop.permute.xlu2 %1013 }
0x12dc   :  { %1165 = vmatmul.msk.f32.vlgmr.msrb.gmra.mxu0 %vm157_vm1, %v1014_v39 }
0x12fd   :  { %v989_v40 = vpop.permute.xlu1 %988 }
0x12fe   :  { %1164 = vmatmul.msk.f32.vlgmr.msra.gmra.mxu3 %vm157_vm1, %v989_v40 }
0x1359   :  { %v1034_v41 = vpop.f32.mrf.mxu0 }
0x1381   :  { %v1009_v43 = vpop.f32.mrf.mxu3 }
0x1382   :  { %v1035_v44 = vadd.f32 %v1034_v41, %v1009_v43 }
0x1384   :  { %v1037_v45 = vadd.f32 %v1535_v42, %v1035_v44  ;;  %v1069_v42 = vsel %vm1067_vm5, %v1618_v24, %v1060_v52  ;;  %v1072_v24 = vld [vmem:[%s1792_s7] sm:$0xff] }
0x1386   :  { %1248 = vtanh.f32 %v1037_v45 }
0x138c   :  { %v1249_v46 = vpop.eup %1248 }
0x138d   :  { %v1039_v47 = vmul.f32 %v1249_v46, %v1460_v17  ;;  %v1075_v17 = vld [vmem:[%s1792_s7 + $0x18] sm:$0xff] }
0x138e   :  { %1170 = vmatpush.msrb.mxu2 %v1075_v17  ;;  %1112 = vmatpush.msrb.mxu1 %v1075_v17 }
0x138f   :  { %v1040_v48 = vadd.f32 %v1039_v47, %v1462_v19  ;;  %v1074_v19 = vld [vmem:[%s1792_s7 + $0x10] sm:$0xff] }
0x1390   :  { %1171 = vmatpush.msrb.mxu2 %v1074_v19  ;;  %1113 = vmatpush.msrb.mxu1 %v1074_v19 }
0x1391   :  { %1043 = vrot.lane.b32.xlu0 %v1040_v48, %s1363_s2  ;;  %v1041_v57 = vmul.f32 %v1040_v48, %v980_v6 }
0x1392   :  { %1172 = vmatpush.msrb.mxu2 %v1073_v5  ;;  %1114 = vmatpush.msrb.mxu1 %v1073_v5 }
0x1394   :  { %1173 = vmatpush.msrb.mxu2 %v1072_v24  ;;  %1115 = vmatpush.msrb.mxu1 %v1072_v24 }
0x1399   :  { %1088 = vrot.lane.b32.xlu0 %v1070_v51, %s1364_s13 }
0x13a1   :  { %1086 = vrot.lane.b32.xlu0 %v1069_v42, %s1364_s13 }
0x1403   :  { %v1044_v61 = vpop.permute.xlu0 %1043 }
0x1404   :  { %v1046_v53 = vmul.f32 %v1044_v61, %v1040_v48 }
0x1406   :  { %1048 = vrot.lane.b32.xlu1 %v1046_v53, %s1364_s13 }
0x140b   :  { %v1089_v55 = vpop.permute.xlu0 %1088 }
0x140c   :  { %1168 = vmatmul.msk.f32.vlgmr.msrb.gmra.mxu2 %vm157_vm1, %v1089_v55 }
0x140e   :  { %1084 = vrot.lane.b32.xlu1 %v1068_v56, %s1364_s13 }
0x1413   :  { %v1087_v63 = vpop.permute.xlu0 %1086 }
0x1478   :  { %v1049_v58 = vpop.permute.xlu1 %1048 }
0x1479   :  { %v1051_v59 = vadd.f32 %v1049_v58, %v1041_v57 }
0x147b   :  { %1250 = vtanh.f32 %v1051_v59 }
0x1480   :  { %v1085_v60 = vpop.permute.xlu1 %1084 }
0x1481   :  { %v1251_v62 = vpop.eup %1250  ;;  %1166 = vmatmul.msk.f32.vlgmr.msrb.gmra.mxu1 %vm157_vm1, %v1085_v60 }
0x1482   :  { %1054 = vrot.lane.b32.xlu2 %v1251_v62, %s1363_s2 }
0x1489   :  { %1167 = vmatmul.msk.f32.gmra.mxu1 %vm157_vm1, %v1087_v63 }
0x148f   :  { %v1123_v34 = vpop.f32.mrf.mxu2 }
0x1490   :  { %v1124_v35 = vadd.f32 %v1187_v50, %v1123_v34 }
0x1492   :  { %1132 = vst.msk [vmem:[%s1794_s9 + $0x10] sm:$0xff] %vm1129_vm6, %v1124_v35 }
0x14dc   :  { %v1055_v8 = vpop.permute.xlu2 %1054 }
0x14dd   :  { %v1057_v36 = vmul.f32 %v1055_v8, %v1040_v48 }
0x14df   :  { %v1065_v0 = vrot.slane %v1057_v36, 4 }
0x14e1   :  { %v1071_v37 = vsel %vm1067_vm5, %v986_v38, %v1065_v0 }
0x14e2   :  { %1090 = vrot.lane.b32.xlu2 %v1071_v37, %s1364_s13 }
0x14fe   :  { %v1117_v1 = vpop.f32.mrf.mxu1 }
0x14ff   :  { %v1118_v28 = vadd.f32 %v1187_v50, %v1117_v1 }
0x1501   :  { %1130 = vst.msk [vmem:[%s1794_s9] sm:$0xff] %vm1129_vm6, %v1118_v28 }
0x1506   :  { %v1120_v29 = vpop.f32.mrf.mxu1 }
0x1507   :  { %v1121_v2 = vadd.f32 %v1187_v50, %v1120_v29 }
0x1509   :  { %1131 = vst.msk [vmem:[%s1794_s9 + $0x8] sm:$0xff] %vm1129_vm6, %v1121_v2 }
0x153c   :  { %v1091_v30 = vpop.permute.xlu2 %1090 }
0x153d   :  { %1169 = vmatmul.msk.f32.gmra.mxu2 %vm157_vm1, %v1091_v30 }
0x15c0   :  { %v1126_v31 = vpop.f32.mrf.mxu2 }
0x15c1   :  { %v1127_v3 = vadd.f32 %v1187_v50, %v1126_v31 }
0x15c3   :  { %1133 = vst.msk [vmem:[%s1794_s9 + $0x18] sm:$0xff] %vm1129_vm6, %v1127_v3 }
0x15c4   :  { %1138 = vsyncpa [#allocation4], 1 }
0x15c5   :  { %1139 = vsyncpa [#allocation6], 1 }
0x15c6   :  { %1140 = vsyncpa [#allocation9], 1 }

</bundles_post_ra>
